<compile_context>
chip_gen: v6e
topology: v6e:2x2x1
jax: 0.10.0
libtpu: 0.0.40
codegen_flags: <defaults>
</compile_context>

<pallas_src>
import functools
import math

import jax
import jax.numpy as jnp
from jax import lax
from jax.experimental import pallas as pl
from jax.experimental.pallas import tpu as pltpu

D_MODEL = 32
HEADS = 4
D_HEAD = D_MODEL // HEADS
D_FF = 64
NEG_INF = -1e18
LN_EPS = 1e-6


def _layer_norm(x, gamma, beta):
    mean = jnp.mean(x, axis=-1, keepdims=True)
    var = jnp.mean((x - mean) ** 2, axis=-1, keepdims=True)
    return (x - mean) * lax.rsqrt(var + LN_EPS) * gamma + beta


def encoder_layer_kernel(len_ref, x_ref,
                         ln1g_ref, ln1b_ref,
                         wq_ref, bq_ref, wk_ref, bk_ref, wv_ref, bv_ref,
                         wo_ref, bo_ref,
                         ln2g_ref, ln2b_ref,
                         w1_ref, b1_ref, w2_ref, b2_ref,
                         o_ref, ctx_ref, *, batch, seq):
    x = x_ref[...]                                            # (B*S, D) f32

    # ---- pre-LayerNorm (f32 elementwise; v5e has no bf16 VPU/EUP path) ----
    xn = _layer_norm(x, ln1g_ref[...], ln1b_ref[...])
    xn_b = xn.astype(jnp.bfloat16)                            # matmul operand only

    # ---- Q/K/V projections: bf16 operands, f32 accumulation.
    #      Three separate matmuls (weights are VMEM-resident anyway); a fused
    #      (D,3D) layout only pays off once D >= 128 so each slice is a whole
    #      lane group.  1/sqrt(d_head) is already folded into wq/bq.
    def proj(w_ref, b_ref):
        return (jnp.dot(xn_b, w_ref[...], preferred_element_type=jnp.float32)
                + b_ref[...]).reshape(batch, seq, D_MODEL)

    q = proj(wq_ref, bq_ref)
    k = proj(wk_ref, bk_ref)
    v = proj(wv_ref, bv_ref)

    # ---- additive padding bias rebuilt from per-batch lengths (SMEM scalars);
    #      no (B,S,S) mask is ever DMA'd from HBM.
    kpos = lax.broadcasted_iota(jnp.int32, (seq, seq), 1)     # key index along lanes
    bias = jnp.concatenate(
        [jnp.where(kpos >= len_ref[b], NEG_INF, 0.0)[None] for b in range(batch)],
        axis=0)                                               # (B, S, S) f32

    # ---- per-head attention.  Heads are lane-contiguous slices of D; context
    #      heads are written into a lane-aligned VMEM scratch so the output
    #      projection is a single full-width matmul after the loop.
    # TODO(synk): for production S, switch to a flash-style online softmax over
    # a KV grid axis marked "arbitrary" with m/l/acc scratch so the (S,S)
    # scores never materialize (needed for v7x's 64 MiB per-TC VMEM).
    for h in range(HEADS):                                    # static, unrolled
        sl = slice(h * D_HEAD, (h + 1) * D_HEAD)
        qh = q[:, :, sl].astype(jnp.bfloat16)
        kh = k[:, :, sl].astype(jnp.bfloat16)
        vh = v[:, :, sl].astype(jnp.bfloat16)
        # Batched over B; contracts the last dims directly (no kh.T).
        s = jnp.einsum('bqd,bkd->bqk', qh, kh,
                       preferred_element_type=jnp.float32) + bias       # (B,S,S) f32
        s_max = jnp.max(s, axis=-1, keepdims=True)
        p = jnp.exp(s - s_max)                                # f32 exp (v5e-safe)
        denom = jnp.sum(p, axis=-1, keepdims=True)
        p = p * pl.reciprocal(denom, approx=True)             # EUP slot, frees VALU
        ctx_h = jnp.einsum('bqk,bkd->bqd', p.astype(jnp.bfloat16), vh,
                           preferred_element_type=jnp.float32)          # (B,S,dh)
        ctx_ref[:, sl] = ctx_h.reshape(batch * seq, D_HEAD)

    # ---- single output projection over all heads (one dense MXU matmul) ----
    attn_out = jnp.dot(ctx_ref[...].astype(jnp.bfloat16), wo_ref[...],
                       preferred_element_type=jnp.float32) + bo_ref[...]
    out1 = attn_out + x                                       # residual (dropout = identity)

    # ---- positionwise feed-forward (own LayerNorm + residual) ----
    yn = _layer_norm(out1, ln2g_ref[...], ln2b_ref[...])
    h1 = jnp.maximum(
        jnp.dot(yn.astype(jnp.bfloat16), w1_ref[...],
                preferred_element_type=jnp.float32) + b1_ref[...], 0.0)
    z = jnp.dot(h1.astype(jnp.bfloat16), w2_ref[...],
                preferred_element_type=jnp.float32) + b2_ref[...]
    # TODO(synk): at production shapes present a lane-dense (multiple-of-128)
    # output slab; at (B*S, D) = (16, 32) the masked store is negligible.
    o_ref[...] = z + out1


PARAM_ORDER = ["ln1_g", "ln1_b", "wq", "bq", "wk", "bk", "wv", "bv",
               "wo", "bo", "ln2_g", "ln2_b", "w1", "b1", "w2", "b2"]


def fuse_params(p):
    """One-time host-side transform: fold 1/sqrt(d_head) into Q and cast the
    weight matrices to bf16 (MXU-native on v5e/v6e/v7x).  LayerNorm params and
    biases stay f32: they feed f32 elementwise adds, not the MXU."""
    scale = 1.0 / math.sqrt(D_HEAD)
    bf16 = jnp.bfloat16
    return {
        "ln1_g": p["ln1_g"], "ln1_b": p["ln1_b"],
        "wq": (p["wq"] * scale).astype(bf16), "bq": p["bq"] * scale,
        "wk": p["wk"].astype(bf16), "bk": p["bk"],
        "wv": p["wv"].astype(bf16), "bv": p["bv"],
        "wo": p["wo"].astype(bf16), "bo": p["bo"],
        "ln2_g": p["ln2_g"], "ln2_b": p["ln2_b"],
        "w1": p["w1"].astype(bf16), "b1": p["b1"],
        "w2": p["w2"].astype(bf16), "b2": p["b2"],
    }


def transformer_encoder_layer(x, lengths, fused_params):
    B, S, D = x.shape
    x2d = x.reshape(B * S, D)      # free reshape outside the kernel; doubles sublane use
    kernel = functools.partial(encoder_layer_kernel, batch=B, seq=S)
    args = [lengths.astype(jnp.int32), x2d] + [fused_params[k] for k in PARAM_ORDER]
    vmem = pl.BlockSpec(memory_space=pltpu.MemorySpace.VMEM)
    smem = pl.BlockSpec(memory_space=pltpu.MemorySpace.SMEM)
    out2d = pl.pallas_call(
        kernel,
        out_shape=jax.ShapeDtypeStruct((B * S, D), jnp.float32),
        # No grid: the whole working set is VMEM-resident for one invocation.
        # TODO(synk): when B*S grows, add a row grid (256-512 row tiles) marked
        # "parallel" (v7x has 2 TensorCores), constant-index weight BlockSpecs
        # so weights are DMA'd once, and re-derive tiles against 64 MiB VMEM.
        in_specs=[smem] + [vmem] * (len(args) - 1),
        out_specs=vmem,
        scratch_shapes=[pltpu.VMEM((B * S, D), jnp.float32)],
        compiler_params=pltpu.CompilerParams(vmem_limit_bytes=32 * 1024 * 1024),
    )(*args)
    return out2d.reshape(B, S, D)


def init_params(key):
    ks = jax.random.split(key, 8)
    s = 0.05
    return {
        "ln1_g": jnp.ones((1, D_MODEL), jnp.float32),
        "ln1_b": jnp.zeros((1, D_MODEL), jnp.float32),
        "wq": s * jax.random.normal(ks[0], (D_MODEL, D_MODEL), jnp.float32),
        "bq": jnp.zeros((1, D_MODEL), jnp.float32),
        "wk": s * jax.random.normal(ks[1], (D_MODEL, D_MODEL), jnp.float32),
        "bk": jnp.zeros((1, D_MODEL), jnp.float32),
        "wv": s * jax.random.normal(ks[2], (D_MODEL, D_MODEL), jnp.float32),
        "bv": jnp.zeros((1, D_MODEL), jnp.float32),
        "wo": s * jax.random.normal(ks[3], (D_MODEL, D_MODEL), jnp.float32),
        "bo": s * jax.random.normal(ks[4], (1, D_MODEL), jnp.float32),
        "ln2_g": jnp.ones((1, D_MODEL), jnp.float32),
        "ln2_b": jnp.zeros((1, D_MODEL), jnp.float32),
        "w1": s * jax.random.normal(ks[5], (D_MODEL, D_FF), jnp.float32),
        "b1": s * jax.random.normal(ks[6], (1, D_FF), jnp.float32),
        "w2": s * jax.random.normal(ks[7], (D_FF, D_MODEL), jnp.float32),
        "b2": jnp.zeros((1, D_MODEL), jnp.float32),
    }


def reference_forward(x, mask, p):
    """Pure-JAX f32 reference matching the PyTorch forward (eval mode)."""
    B, S, D = x.shape
    dh = D_MODEL // HEADS

    xn = _layer_norm(x, p["ln1_g"], p["ln1_b"])
    q = xn @ p["wq"] + p["bq"]
    k = xn @ p["wk"] + p["bk"]
    v = xn @ p["wv"] + p["bv"]

    def split(t):  # (B,S,D) -> (B,H,S,dh)
        return t.reshape(B, S, HEADS, dh).transpose(0, 2, 1, 3)

    qh, kh, vh = split(q) / math.sqrt(dh), split(k), split(v)
    scores = jnp.einsum("bhqd,bhkd->bhqk", qh, kh)
    scores = jnp.where(mask[:, None, :, :] != 0, NEG_INF, scores)
    attn = jax.nn.softmax(scores, axis=-1)
    ctx = jnp.einsum("bhqk,bhkd->bhqd", attn, vh)
    ctx = ctx.transpose(0, 2, 1, 3).reshape(B, S, D)
    attn_out = ctx @ p["wo"] + p["bo"]
    out1 = attn_out + x

    yn = _layer_norm(out1, p["ln2_g"], p["ln2_b"])
    h1 = jnp.maximum(yn @ p["w1"] + p["b1"], 0.0)
    z = h1 @ p["w2"] + p["b2"]
    return z + out1


if __name__ == "__main__":
    key = jax.random.PRNGKey(0)
    kx, kp = jax.random.split(key)

    B, S = 2, 8
    x = jax.random.normal(kx, (B, S, D_MODEL), jnp.float32)

    # Padding mask (OpenNMT style): mask != 0 means "masked out".
    lengths = jnp.array([8, 6], jnp.int32)
    pos = jnp.arange(S)
    mask = (pos[None, None, :] >= lengths[:, None, None]).astype(jnp.float32)
    mask = jnp.broadcast_to(mask, (B, S, S))   # dense mask only for the f32 reference

    params = init_params(kp)
    fused = fuse_params(params)      # one-time host-side scale folding + bf16 cast

    out = transformer_encoder_layer(x, lengths, fused)
    jax.block_until_ready(out)

    ref = reference_forward(x, mask, params)
    assert out.shape == (B, S, D_MODEL)
    # Tolerance covers bf16 matmul operands + approx EUP reciprocal in softmax.
    assert jnp.allclose(out, ref, atol=2e-2, rtol=2e-2), "kernel mismatch vs reference"

    print("KERNEL_OK")
</pallas_src>

<mosaic_0001>
module attributes {stable_mosaic.version = 11 : i64} {
  func.func @encoder_layer_kernel(%arg0: memref<2xi32, #tpu.memory_space<smem>>, %arg1: memref<16x32xf32, #tpu.memory_space<vmem>>, %arg2: memref<1x32xf32, #tpu.memory_space<vmem>>, %arg3: memref<1x32xf32, #tpu.memory_space<vmem>>, %arg4: memref<32x32xbf16, #tpu.memory_space<vmem>>, %arg5: memref<1x32xf32, #tpu.memory_space<vmem>>, %arg6: memref<32x32xbf16, #tpu.memory_space<vmem>>, %arg7: memref<1x32xf32, #tpu.memory_space<vmem>>, %arg8: memref<32x32xbf16, #tpu.memory_space<vmem>>, %arg9: memref<1x32xf32, #tpu.memory_space<vmem>>, %arg10: memref<32x32xbf16, #tpu.memory_space<vmem>>, %arg11: memref<1x32xf32, #tpu.memory_space<vmem>>, %arg12: memref<1x32xf32, #tpu.memory_space<vmem>>, %arg13: memref<1x32xf32, #tpu.memory_space<vmem>>, %arg14: memref<32x64xbf16, #tpu.memory_space<vmem>>, %arg15: memref<1x64xf32, #tpu.memory_space<vmem>>, %arg16: memref<64x32xbf16, #tpu.memory_space<vmem>>, %arg17: memref<1x32xf32, #tpu.memory_space<vmem>>, %arg18: memref<16x32xf32, #tpu.memory_space<vmem>>, %arg19: memref<16x32xf32, #tpu.memory_space<vmem>>) attributes {dimension_semantics = [], scalar_prefetch = 0 : i64, scratch_operands = 1 : i64, tpu.core_type = #tpu.core_type<tc>} {
    %c0 = arith.constant 0 : index
    %c0_0 = arith.constant 0 : index
    %0 = vector.load %arg1[%c0, %c0_0] : memref<16x32xf32, #tpu.memory_space<vmem>>, vector<16x32xf32>
    %c0_1 = arith.constant 0 : index
    %c0_2 = arith.constant 0 : index
    %1 = vector.load %arg2[%c0_1, %c0_2] : memref<1x32xf32, #tpu.memory_space<vmem>>, vector<1x32xf32>
    %c0_3 = arith.constant 0 : index
    %c0_4 = arith.constant 0 : index
    %2 = vector.load %arg3[%c0_3, %c0_4] : memref<1x32xf32, #tpu.memory_space<vmem>>, vector<1x32xf32>
    %cst = arith.constant dense<0.000000e+00> : vector<16xf32>
    %3 = vector.multi_reduction <add>, %0, %cst [1] : vector<16x32xf32> to vector<16xf32>
    %4 = vector.shape_cast %3 : vector<16xf32> to vector<16x1xf32>
    %cst_5 = arith.constant 3.200000e+01 : f32
    %5 = vector.broadcast %cst_5 : f32 to vector<16x1xf32>
    %6 = arith.divf %4, %5 : vector<16x1xf32>
    %7 = vector.broadcast %6 : vector<16x1xf32> to vector<16x32xf32>
    %8 = arith.subf %0, %7 : vector<16x32xf32>
    %9 = arith.mulf %8, %8 : vector<16x32xf32>
    %cst_6 = arith.constant dense<0.000000e+00> : vector<16xf32>
    %10 = vector.multi_reduction <add>, %9, %cst_6 [1] : vector<16x32xf32> to vector<16xf32>
    %11 = vector.shape_cast %10 : vector<16xf32> to vector<16x1xf32>
    %cst_7 = arith.constant 3.200000e+01 : f32
    %12 = vector.broadcast %cst_7 : f32 to vector<16x1xf32>
    %13 = arith.divf %11, %12 : vector<16x1xf32>
    %14 = vector.broadcast %6 : vector<16x1xf32> to vector<16x32xf32>
    %15 = arith.subf %0, %14 : vector<16x32xf32>
    %cst_8 = arith.constant 9.99999997E-7 : f32
    %16 = vector.broadcast %cst_8 : f32 to vector<16x1xf32>
    %17 = arith.addf %13, %16 : vector<16x1xf32>
    %18 = math.rsqrt %17 : vector<16x1xf32>
    %19 = vector.broadcast %18 : vector<16x1xf32> to vector<16x32xf32>
    %20 = arith.mulf %15, %19 : vector<16x32xf32>
    %21 = vector.broadcast %1 : vector<1x32xf32> to vector<16x32xf32>
    %22 = arith.mulf %20, %21 : vector<16x32xf32>
    %23 = vector.broadcast %2 : vector<1x32xf32> to vector<16x32xf32>
    %24 = arith.addf %22, %23 : vector<16x32xf32>
    %25 = arith.truncf %24 : vector<16x32xf32> to vector<16x32xbf16>
    %c0_9 = arith.constant 0 : index
    %c0_10 = arith.constant 0 : index
    %26 = vector.load %arg4[%c0_9, %c0_10] : memref<32x32xbf16, #tpu.memory_space<vmem>>, vector<32x32xbf16>
    %cst_11 = arith.constant dense<0.000000e+00> : vector<16x32xf32>
    %27 = tpu.matmul %25, %26, %cst_11 {dimension_numbers = #tpu.dot_dimension_numbers<[1], [0], [0], [1], [0, 0, 1, 1], [], []>} : vector<16x32xbf16>, vector<32x32xbf16>, vector<16x32xf32> -> vector<16x32xf32>
    %c0_12 = arith.constant 0 : index
    %c0_13 = arith.constant 0 : index
    %28 = vector.load %arg5[%c0_12, %c0_13] : memref<1x32xf32, #tpu.memory_space<vmem>>, vector<1x32xf32>
    %29 = vector.broadcast %28 : vector<1x32xf32> to vector<16x32xf32>
    %30 = arith.addf %27, %29 : vector<16x32xf32>
    %31 = vector.shape_cast %30 : vector<16x32xf32> to vector<2x8x32xf32>
    %c0_14 = arith.constant 0 : index
    %c0_15 = arith.constant 0 : index
    %32 = vector.load %arg6[%c0_14, %c0_15] : memref<32x32xbf16, #tpu.memory_space<vmem>>, vector<32x32xbf16>
    %cst_16 = arith.constant dense<0.000000e+00> : vector<16x32xf32>
    %33 = tpu.matmul %25, %32, %cst_16 {dimension_numbers = #tpu.dot_dimension_numbers<[1], [0], [0], [1], [0, 0, 1, 1], [], []>} : vector<16x32xbf16>, vector<32x32xbf16>, vector<16x32xf32> -> vector<16x32xf32>
    %c0_17 = arith.constant 0 : index
    %c0_18 = arith.constant 0 : index
    %34 = vector.load %arg7[%c0_17, %c0_18] : memref<1x32xf32, #tpu.memory_space<vmem>>, vector<1x32xf32>
    %35 = vector.broadcast %34 : vector<1x32xf32> to vector<16x32xf32>
    %36 = arith.addf %33, %35 : vector<16x32xf32>
    %37 = vector.shape_cast %36 : vector<16x32xf32> to vector<2x8x32xf32>
    %c0_19 = arith.constant 0 : index
    %c0_20 = arith.constant 0 : index
    %38 = vector.load %arg8[%c0_19, %c0_20] : memref<32x32xbf16, #tpu.memory_space<vmem>>, vector<32x32xbf16>
    %cst_21 = arith.constant dense<0.000000e+00> : vector<16x32xf32>
    %39 = tpu.matmul %25, %38, %cst_21 {dimension_numbers = #tpu.dot_dimension_numbers<[1], [0], [0], [1], [0, 0, 1, 1], [], []>} : vector<16x32xbf16>, vector<32x32xbf16>, vector<16x32xf32> -> vector<16x32xf32>
    %c0_22 = arith.constant 0 : index
    %c0_23 = arith.constant 0 : index
    %40 = vector.load %arg9[%c0_22, %c0_23] : memref<1x32xf32, #tpu.memory_space<vmem>>, vector<1x32xf32>
    %41 = vector.broadcast %40 : vector<1x32xf32> to vector<16x32xf32>
    %42 = arith.addf %39, %41 : vector<16x32xf32>
    %43 = vector.shape_cast %42 : vector<16x32xf32> to vector<2x8x32xf32>
    %44 = tpu.iota {dimensions = array<i32: 1>} : vector<8x8xi32>
    %c0_24 = arith.constant 0 : index
    %45 = memref.load %arg0[%c0_24] : memref<2xi32, #tpu.memory_space<smem>>
    %46 = vector.broadcast %45 : i32 to vector<8x8xi32>
    %47 = arith.cmpi sge, %44, %46 : vector<8x8xi32>
    %cst_25 = arith.constant -9.99999984E+17 : f32
    %cst_26 = arith.constant 0.000000e+00 : f32
    %48 = vector.broadcast %cst_25 : f32 to vector<8x8xf32>
    %49 = vector.broadcast %cst_26 : f32 to vector<8x8xf32>
    %50 = arith.select %47, %48, %49 : vector<8x8xi1>, vector<8x8xf32>
    %51 = vector.shape_cast %50 : vector<8x8xf32> to vector<1x8x8xf32>
    %c1 = arith.constant 1 : index
    %52 = memref.load %arg0[%c1] : memref<2xi32, #tpu.memory_space<smem>>
    %53 = vector.broadcast %52 : i32 to vector<8x8xi32>
    %54 = arith.cmpi sge, %44, %53 : vector<8x8xi32>
    %cst_27 = arith.constant -9.99999984E+17 : f32
    %cst_28 = arith.constant 0.000000e+00 : f32
    %55 = vector.broadcast %cst_27 : f32 to vector<8x8xf32>
    %56 = vector.broadcast %cst_28 : f32 to vector<8x8xf32>
    %57 = arith.select %54, %55, %56 : vector<8x8xi1>, vector<8x8xf32>
    %58 = vector.shape_cast %57 : vector<8x8xf32> to vector<1x8x8xf32>
    %59 = tpu.concatenate %51, %58 in 0 : vector<1x8x8xf32>, vector<1x8x8xf32> -> vector<2x8x8xf32>
    %60 = vector.extract_strided_slice %31 {offsets = [0, 0, 0], sizes = [2, 8, 8], strides = [1, 1, 1]} : vector<2x8x32xf32> to vector<2x8x8xf32>
    %61 = arith.truncf %60 : vector<2x8x8xf32> to vector<2x8x8xbf16>
    %62 = vector.extract_strided_slice %37 {offsets = [0, 0, 0], sizes = [2, 8, 8], strides = [1, 1, 1]} : vector<2x8x32xf32> to vector<2x8x8xf32>
    %63 = arith.truncf %62 : vector<2x8x8xf32> to vector<2x8x8xbf16>
    %64 = vector.extract_strided_slice %43 {offsets = [0, 0, 0], sizes = [2, 8, 8], strides = [1, 1, 1]} : vector<2x8x32xf32> to vector<2x8x8xf32>
    %65 = arith.truncf %64 : vector<2x8x8xf32> to vector<2x8x8xbf16>
    "tpu.trace_start"() <{level = 10 : i32, message = "bqd,bkd->bqk"}> : () -> ()
    %cst_29 = arith.constant dense<0.000000e+00> : vector<2x8x8xf32>
    %66 = tpu.matmul %61, %63, %cst_29 {dimension_numbers = #tpu.dot_dimension_numbers<[2], [2], [1], [1], [0, 0, 0, 1, 1, 1], [0], [0]>} : vector<2x8x8xbf16>, vector<2x8x8xbf16>, vector<2x8x8xf32> -> vector<2x8x8xf32>
    "tpu.trace_stop"() : () -> ()
    %67 = arith.addf %66, %59 : vector<2x8x8xf32>
    %cst_30 = arith.constant dense<0xFF800000> : vector<2x8xf32>
    %68 = vector.multi_reduction <maximumf>, %67, %cst_30 [2] : vector<2x8x8xf32> to vector<2x8xf32>
    %69 = vector.shape_cast %68 : vector<2x8xf32> to vector<2x8x1xf32>
    %70 = vector.broadcast %69 : vector<2x8x1xf32> to vector<2x8x8xf32>
    %71 = arith.subf %67, %70 : vector<2x8x8xf32>
    %72 = math.exp %71 : vector<2x8x8xf32>
    %cst_31 = arith.constant dense<0.000000e+00> : vector<2x8xf32>
    %73 = vector.multi_reduction <add>, %72, %cst_31 [2] : vector<2x8x8xf32> to vector<2x8xf32>
    %74 = vector.shape_cast %73 : vector<2x8xf32> to vector<2x8x1xf32>
    %75 = tpu.reciprocal %74 {approx = true} : vector<2x8x1xf32> -> vector<2x8x1xf32>
    %76 = vector.broadcast %75 : vector<2x8x1xf32> to vector<2x8x8xf32>
    %77 = arith.mulf %72, %76 : vector<2x8x8xf32>
    %78 = arith.truncf %77 : vector<2x8x8xf32> to vector<2x8x8xbf16>
    "tpu.trace_start"() <{level = 10 : i32, message = "bqk,bkd->bqd"}> : () -> ()
    %cst_32 = arith.constant dense<0.000000e+00> : vector<2x8x8xf32>
    %79 = tpu.matmul %78, %65, %cst_32 {dimension_numbers = #tpu.dot_dimension_numbers<[2], [1], [1], [2], [0, 0, 0, 1, 1, 2], [0], [0]>} : vector<2x8x8xbf16>, vector<2x8x8xbf16>, vector<2x8x8xf32> -> vector<2x8x8xf32>
    "tpu.trace_stop"() : () -> ()
    %80 = vector.shape_cast %79 : vector<2x8x8xf32> to vector<16x8xf32>
    %c0_33 = arith.constant 0 : index
    %c0_34 = arith.constant 0 : index
    %81 = vector.load %arg19[%c0_33, %c0_34] : memref<16x32xf32, #tpu.memory_space<vmem>>, vector<16x8xf32>
    tpu.vector_store %arg19[%c0_33, %c0_34], %80 {strides = array<i32>} : memref<16x32xf32, #tpu.memory_space<vmem>>, vector<16x8xf32>,
    %82 = vector.extract_strided_slice %31 {offsets = [0, 0, 8], sizes = [2, 8, 8], strides = [1, 1, 1]} : vector<2x8x32xf32> to vector<2x8x8xf32>
    %83 = arith.truncf %82 : vector<2x8x8xf32> to vector<2x8x8xbf16>
    %84 = vector.extract_strided_slice %37 {offsets = [0, 0, 8], sizes = [2, 8, 8], strides = [1, 1, 1]} : vector<2x8x32xf32> to vector<2x8x8xf32>
    %85 = arith.truncf %84 : vector<2x8x8xf32> to vector<2x8x8xbf16>
    %86 = vector.extract_strided_slice %43 {offsets = [0, 0, 8], sizes = [2, 8, 8], strides = [1, 1, 1]} : vector<2x8x32xf32> to vector<2x8x8xf32>
    %87 = arith.truncf %86 : vector<2x8x8xf32> to vector<2x8x8xbf16>
    "tpu.trace_start"() <{level = 10 : i32, message = "bqd,bkd->bqk"}> : () -> ()
    %cst_35 = arith.constant dense<0.000000e+00> : vector<2x8x8xf32>
    %88 = tpu.matmul %83, %85, %cst_35 {dimension_numbers = #tpu.dot_dimension_numbers<[2], [2], [1], [1], [0, 0, 0, 1, 1, 1], [0], [0]>} : vector<2x8x8xbf16>, vector<2x8x8xbf16>, vector<2x8x8xf32> -> vector<2x8x8xf32>
    "tpu.trace_stop"() : () -> ()
    %89 = arith.addf %88, %59 : vector<2x8x8xf32>
    %cst_36 = arith.constant dense<0xFF800000> : vector<2x8xf32>
    %90 = vector.multi_reduction <maximumf>, %89, %cst_36 [2] : vector<2x8x8xf32> to vector<2x8xf32>
    %91 = vector.shape_cast %90 : vector<2x8xf32> to vector<2x8x1xf32>
    %92 = vector.broadcast %91 : vector<2x8x1xf32> to vector<2x8x8xf32>
    %93 = arith.subf %89, %92 : vector<2x8x8xf32>
    %94 = math.exp %93 : vector<2x8x8xf32>
    %cst_37 = arith.constant dense<0.000000e+00> : vector<2x8xf32>
    %95 = vector.multi_reduction <add>, %94, %cst_37 [2] : vector<2x8x8xf32> to vector<2x8xf32>
    %96 = vector.shape_cast %95 : vector<2x8xf32> to vector<2x8x1xf32>
    %97 = tpu.reciprocal %96 {approx = true} : vector<2x8x1xf32> -> vector<2x8x1xf32>
    %98 = vector.broadcast %97 : vector<2x8x1xf32> to vector<2x8x8xf32>
    %99 = arith.mulf %94, %98 : vector<2x8x8xf32>
    %100 = arith.truncf %99 : vector<2x8x8xf32> to vector<2x8x8xbf16>
    "tpu.trace_start"() <{level = 10 : i32, message = "bqk,bkd->bqd"}> : () -> ()
    %cst_38 = arith.constant dense<0.000000e+00> : vector<2x8x8xf32>
    %101 = tpu.matmul %100, %87, %cst_38 {dimension_numbers = #tpu.dot_dimension_numbers<[2], [1], [1], [2], [0, 0, 0, 1, 1, 2], [0], [0]>} : vector<2x8x8xbf16>, vector<2x8x8xbf16>, vector<2x8x8xf32> -> vector<2x8x8xf32>
    "tpu.trace_stop"() : () -> ()
    %102 = vector.shape_cast %101 : vector<2x8x8xf32> to vector<16x8xf32>
    %c0_39 = arith.constant 0 : index
    %c8 = arith.constant 8 : index
    %103 = vector.load %arg19[%c0_39, %c8] : memref<16x32xf32, #tpu.memory_space<vmem>>, vector<16x8xf32>
    tpu.vector_store %arg19[%c0_39, %c8], %102 {strides = array<i32>} : memref<16x32xf32, #tpu.memory_space<vmem>>, vector<16x8xf32>,
    %104 = vector.extract_strided_slice %31 {offsets = [0, 0, 16], sizes = [2, 8, 8], strides = [1, 1, 1]} : vector<2x8x32xf32> to vector<2x8x8xf32>
    %105 = arith.truncf %104 : vector<2x8x8xf32> to vector<2x8x8xbf16>
    %106 = vector.extract_strided_slice %37 {offsets = [0, 0, 16], sizes = [2, 8, 8], strides = [1, 1, 1]} : vector<2x8x32xf32> to vector<2x8x8xf32>
    %107 = arith.truncf %106 : vector<2x8x8xf32> to vector<2x8x8xbf16>
    %108 = vector.extract_strided_slice %43 {offsets = [0, 0, 16], sizes = [2, 8, 8], strides = [1, 1, 1]} : vector<2x8x32xf32> to vector<2x8x8xf32>
    %109 = arith.truncf %108 : vector<2x8x8xf32> to vector<2x8x8xbf16>
    "tpu.trace_start"() <{level = 10 : i32, message = "bqd,bkd->bqk"}> : () -> ()
    %cst_40 = arith.constant dense<0.000000e+00> : vector<2x8x8xf32>
    %110 = tpu.matmul %105, %107, %cst_40 {dimension_numbers = #tpu.dot_dimension_numbers<[2], [2], [1], [1], [0, 0, 0, 1, 1, 1], [0], [0]>} : vector<2x8x8xbf16>, vector<2x8x8xbf16>, vector<2x8x8xf32> -> vector<2x8x8xf32>
    "tpu.trace_stop"() : () -> ()
    %111 = arith.addf %110, %59 : vector<2x8x8xf32>
    %cst_41 = arith.constant dense<0xFF800000> : vector<2x8xf32>
    %112 = vector.multi_reduction <maximumf>, %111, %cst_41 [2] : vector<2x8x8xf32> to vector<2x8xf32>
    %113 = vector.shape_cast %112 : vector<2x8xf32> to vector<2x8x1xf32>
    %114 = vector.broadcast %113 : vector<2x8x1xf32> to vector<2x8x8xf32>
    %115 = arith.subf %111, %114 : vector<2x8x8xf32>
    %116 = math.exp %115 : vector<2x8x8xf32>
    %cst_42 = arith.constant dense<0.000000e+00> : vector<2x8xf32>
    %117 = vector.multi_reduction <add>, %116, %cst_42 [2] : vector<2x8x8xf32> to vector<2x8xf32>
    %118 = vector.shape_cast %117 : vector<2x8xf32> to vector<2x8x1xf32>
    %119 = tpu.reciprocal %118 {approx = true} : vector<2x8x1xf32> -> vector<2x8x1xf32>
    %120 = vector.broadcast %119 : vector<2x8x1xf32> to vector<2x8x8xf32>
    %121 = arith.mulf %116, %120 : vector<2x8x8xf32>
    %122 = arith.truncf %121 : vector<2x8x8xf32> to vector<2x8x8xbf16>
    "tpu.trace_start"() <{level = 10 : i32, message = "bqk,bkd->bqd"}> : () -> ()
    %cst_43 = arith.constant dense<0.000000e+00> : vector<2x8x8xf32>
    %123 = tpu.matmul %122, %109, %cst_43 {dimension_numbers = #tpu.dot_dimension_numbers<[2], [1], [1], [2], [0, 0, 0, 1, 1, 2], [0], [0]>} : vector<2x8x8xbf16>, vector<2x8x8xbf16>, vector<2x8x8xf32> -> vector<2x8x8xf32>
    "tpu.trace_stop"() : () -> ()
    %124 = vector.shape_cast %123 : vector<2x8x8xf32> to vector<16x8xf32>
    %c0_44 = arith.constant 0 : index
    %c16 = arith.constant 16 : index
    %125 = vector.load %arg19[%c0_44, %c16] : memref<16x32xf32, #tpu.memory_space<vmem>>, vector<16x8xf32>
    tpu.vector_store %arg19[%c0_44, %c16], %124 {strides = array<i32>} : memref<16x32xf32, #tpu.memory_space<vmem>>, vector<16x8xf32>,
    %126 = vector.extract_strided_slice %31 {offsets = [0, 0, 24], sizes = [2, 8, 8], strides = [1, 1, 1]} : vector<2x8x32xf32> to vector<2x8x8xf32>
    %127 = arith.truncf %126 : vector<2x8x8xf32> to vector<2x8x8xbf16>
    %128 = vector.extract_strided_slice %37 {offsets = [0, 0, 24], sizes = [2, 8, 8], strides = [1, 1, 1]} : vector<2x8x32xf32> to vector<2x8x8xf32>
    %129 = arith.truncf %128 : vector<2x8x8xf32> to vector<2x8x8xbf16>
    %130 = vector.extract_strided_slice %43 {offsets = [0, 0, 24], sizes = [2, 8, 8], strides = [1, 1, 1]} : vector<2x8x32xf32> to vector<2x8x8xf32>
    %131 = arith.truncf %130 : vector<2x8x8xf32> to vector<2x8x8xbf16>
    "tpu.trace_start"() <{level = 10 : i32, message = "bqd,bkd->bqk"}> : () -> ()
    %cst_45 = arith.constant dense<0.000000e+00> : vector<2x8x8xf32>
    %132 = tpu.matmul %127, %129, %cst_45 {dimension_numbers = #tpu.dot_dimension_numbers<[2], [2], [1], [1], [0, 0, 0, 1, 1, 1], [0], [0]>} : vector<2x8x8xbf16>, vector<2x8x8xbf16>, vector<2x8x8xf32> -> vector<2x8x8xf32>
    "tpu.trace_stop"() : () -> ()
    %133 = arith.addf %132, %59 : vector<2x8x8xf32>
    %cst_46 = arith.constant dense<0xFF800000> : vector<2x8xf32>
    %134 = vector.multi_reduction <maximumf>, %133, %cst_46 [2] : vector<2x8x8xf32> to vector<2x8xf32>
    %135 = vector.shape_cast %134 : vector<2x8xf32> to vector<2x8x1xf32>
    %136 = vector.broadcast %135 : vector<2x8x1xf32> to vector<2x8x8xf32>
    %137 = arith.subf %133, %136 : vector<2x8x8xf32>
    %138 = math.exp %137 : vector<2x8x8xf32>
    %cst_47 = arith.constant dense<0.000000e+00> : vector<2x8xf32>
    %139 = vector.multi_reduction <add>, %138, %cst_47 [2] : vector<2x8x8xf32> to vector<2x8xf32>
    %140 = vector.shape_cast %139 : vector<2x8xf32> to vector<2x8x1xf32>
    %141 = tpu.reciprocal %140 {approx = true} : vector<2x8x1xf32> -> vector<2x8x1xf32>
    %142 = vector.broadcast %141 : vector<2x8x1xf32> to vector<2x8x8xf32>
    %143 = arith.mulf %138, %142 : vector<2x8x8xf32>
    %144 = arith.truncf %143 : vector<2x8x8xf32> to vector<2x8x8xbf16>
    "tpu.trace_start"() <{level = 10 : i32, message = "bqk,bkd->bqd"}> : () -> ()
    %cst_48 = arith.constant dense<0.000000e+00> : vector<2x8x8xf32>
    %145 = tpu.matmul %144, %131, %cst_48 {dimension_numbers = #tpu.dot_dimension_numbers<[2], [1], [1], [2], [0, 0, 0, 1, 1, 2], [0], [0]>} : vector<2x8x8xbf16>, vector<2x8x8xbf16>, vector<2x8x8xf32> -> vector<2x8x8xf32>
    "tpu.trace_stop"() : () -> ()
    %146 = vector.shape_cast %145 : vector<2x8x8xf32> to vector<16x8xf32>
    %c0_49 = arith.constant 0 : index
    %c24 = arith.constant 24 : index
    %147 = vector.load %arg19[%c0_49, %c24] : memref<16x32xf32, #tpu.memory_space<vmem>>, vector<16x8xf32>
    tpu.vector_store %arg19[%c0_49, %c24], %146 {strides = array<i32>} : memref<16x32xf32, #tpu.memory_space<vmem>>, vector<16x8xf32>,
    %c0_50 = arith.constant 0 : index
    %c0_51 = arith.constant 0 : index
    %148 = vector.load %arg19[%c0_50, %c0_51] : memref<16x32xf32, #tpu.memory_space<vmem>>, vector<16x32xf32>
    %149 = arith.truncf %148 : vector<16x32xf32> to vector<16x32xbf16>
    %c0_52 = arith.constant 0 : index
    %c0_53 = arith.constant 0 : index
    %150 = vector.load %arg10[%c0_52, %c0_53] : memref<32x32xbf16, #tpu.memory_space<vmem>>, vector<32x32xbf16>
    %cst_54 = arith.constant dense<0.000000e+00> : vector<16x32xf32>
    %151 = tpu.matmul %149, %150, %cst_54 {dimension_numbers = #tpu.dot_dimension_numbers<[1], [0], [0], [1], [0, 0, 1, 1], [], []>} : vector<16x32xbf16>, vector<32x32xbf16>, vector<16x32xf32> -> vector<16x32xf32>
    %c0_55 = arith.constant 0 : index
    %c0_56 = arith.constant 0 : index
    %152 = vector.load %arg11[%c0_55, %c0_56] : memref<1x32xf32, #tpu.memory_space<vmem>>, vector<1x32xf32>
    %153 = vector.broadcast %152 : vector<1x32xf32> to vector<16x32xf32>
    %154 = arith.addf %151, %153 : vector<16x32xf32>
    %155 = arith.addf %154, %0 : vector<16x32xf32>
    %c0_57 = arith.constant 0 : index
    %c0_58 = arith.constant 0 : index
    %156 = vector.load %arg12[%c0_57, %c0_58] : memref<1x32xf32, #tpu.memory_space<vmem>>, vector<1x32xf32>
    %c0_59 = arith.constant 0 : index
    %c0_60 = arith.constant 0 : index
    %157 = vector.load %arg13[%c0_59, %c0_60] : memref<1x32xf32, #tpu.memory_space<vmem>>, vector<1x32xf32>
    %cst_61 = arith.constant dense<0.000000e+00> : vector<16xf32>
    %158 = vector.multi_reduction <add>, %155, %cst_61 [1] : vector<16x32xf32> to vector<16xf32>
    %159 = vector.shape_cast %158 : vector<16xf32> to vector<16x1xf32>
    %cst_62 = arith.constant 3.200000e+01 : f32
    %160 = vector.broadcast %cst_62 : f32 to vector<16x1xf32>
    %161 = arith.divf %159, %160 : vector<16x1xf32>
    %162 = vector.broadcast %161 : vector<16x1xf32> to vector<16x32xf32>
    %163 = arith.subf %155, %162 : vector<16x32xf32>
    %164 = arith.mulf %163, %163 : vector<16x32xf32>
    %cst_63 = arith.constant dense<0.000000e+00> : vector<16xf32>
    %165 = vector.multi_reduction <add>, %164, %cst_63 [1] : vector<16x32xf32> to vector<16xf32>
    %166 = vector.shape_cast %165 : vector<16xf32> to vector<16x1xf32>
    %cst_64 = arith.constant 3.200000e+01 : f32
    %167 = vector.broadcast %cst_64 : f32 to vector<16x1xf32>
    %168 = arith.divf %166, %167 : vector<16x1xf32>
    %169 = vector.broadcast %161 : vector<16x1xf32> to vector<16x32xf32>
    %170 = arith.subf %155, %169 : vector<16x32xf32>
    %cst_65 = arith.constant 9.99999997E-7 : f32
    %171 = vector.broadcast %cst_65 : f32 to vector<16x1xf32>
    %172 = arith.addf %168, %171 : vector<16x1xf32>
    %173 = math.rsqrt %172 : vector<16x1xf32>
    %174 = vector.broadcast %173 : vector<16x1xf32> to vector<16x32xf32>
    %175 = arith.mulf %170, %174 : vector<16x32xf32>
    %176 = vector.broadcast %156 : vector<1x32xf32> to vector<16x32xf32>
    %177 = arith.mulf %175, %176 : vector<16x32xf32>
    %178 = vector.broadcast %157 : vector<1x32xf32> to vector<16x32xf32>
    %179 = arith.addf %177, %178 : vector<16x32xf32>
    %180 = arith.truncf %179 : vector<16x32xf32> to vector<16x32xbf16>
    %c0_66 = arith.constant 0 : index
    %c0_67 = arith.constant 0 : index
    %181 = vector.load %arg14[%c0_66, %c0_67] : memref<32x64xbf16, #tpu.memory_space<vmem>>, vector<32x64xbf16>
    %cst_68 = arith.constant dense<0.000000e+00> : vector<16x64xf32>
    %182 = tpu.matmul %180, %181, %cst_68 {dimension_numbers = #tpu.dot_dimension_numbers<[1], [0], [0], [1], [0, 0, 1, 1], [], []>} : vector<16x32xbf16>, vector<32x64xbf16>, vector<16x64xf32> -> vector<16x64xf32>
    %c0_69 = arith.constant 0 : index
    %c0_70 = arith.constant 0 : index
    %183 = vector.load %arg15[%c0_69, %c0_70] : memref<1x64xf32, #tpu.memory_space<vmem>>, vector<1x64xf32>
    %184 = vector.broadcast %183 : vector<1x64xf32> to vector<16x64xf32>
    %185 = arith.addf %182, %184 : vector<16x64xf32>
    %cst_71 = arith.constant 0.000000e+00 : f32
    %186 = vector.broadcast %cst_71 : f32 to vector<16x64xf32>
    %187 = arith.maximumf %185, %186 : vector<16x64xf32>
    %188 = arith.truncf %187 : vector<16x64xf32> to vector<16x64xbf16>
    %c0_72 = arith.constant 0 : index
    %c0_73 = arith.constant 0 : index
    %189 = vector.load %arg16[%c0_72, %c0_73] : memref<64x32xbf16, #tpu.memory_space<vmem>>, vector<64x32xbf16>
    %cst_74 = arith.constant dense<0.000000e+00> : vector<16x32xf32>
    %190 = tpu.matmul %188, %189, %cst_74 {dimension_numbers = #tpu.dot_dimension_numbers<[1], [0], [0], [1], [0, 0, 1, 1], [], []>} : vector<16x64xbf16>, vector<64x32xbf16>, vector<16x32xf32> -> vector<16x32xf32>
    %c0_75 = arith.constant 0 : index
    %c0_76 = arith.constant 0 : index
    %191 = vector.load %arg17[%c0_75, %c0_76] : memref<1x32xf32, #tpu.memory_space<vmem>>, vector<1x32xf32>
    %192 = vector.broadcast %191 : vector<1x32xf32> to vector<16x32xf32>
    %193 = arith.addf %190, %192 : vector<16x32xf32>
    %194 = arith.addf %193, %155 : vector<16x32xf32>
    %c0_77 = arith.constant 0 : index
    %c0_78 = arith.constant 0 : index
    %195 = vector.load %arg18[%c0_77, %c0_78] : memref<16x32xf32, #tpu.memory_space<vmem>>, vector<16x32xf32>
    tpu.vector_store %arg18[%c0_77, %c0_78], %194 {strides = array<i32>} : memref<16x32xf32, #tpu.memory_space<vmem>>, vector<16x32xf32>,
    return
  }
}

</mosaic_0001>

<bundles_post_ra>
// kernel: tpu_custom_call.1
= control target key start
LH: loop header
LB: loop body
LE: loop exit
PB: predicated region body
PF: predicated region fallthrough
CT: control target
= control target key end

     0   :  { %s2556_s0 = inlined_call_operand.hbm [shape: s32[2], index: 0, kind: input, shape index: {}]   ;;  %s2557_s1 = inlined_call_operand.vmem [shape: f32[16,32], index: 1, kind: input, shape index: {}]   ;;  %s2558_s2 = inlined_call_operand.hbm [shape: f32[1,32], index: 2, kind: input, shape index: {}]   ;;  %s2559_s3 = inlined_call_operand.hbm [shape: f32[1,32], index: 3, kind: input, shape index: {}]   ;;  %s2560_s4 = inlined_call_operand.vmem [shape: bf16[32,32], index: 4, kind: input, shape index: {}]   ;;  %s2561_s5 = inlined_call_operand.hbm [shape: f32[1,32], index: 5, kind: input, shape index: {}]   ;;  %s2562_s6 = inlined_call_operand.vmem [shape: bf16[32,32], index: 6, kind: input, shape index: {}]   ;;  %s2563_s7 = inlined_call_operand.hbm [shape: f32[1,32], index: 7, kind: input, shape index: {}]   ;;  %s2564_s8 = inlined_call_operand.hbm [shape: bf16[32,32], index: 8, kind: input, shape index: {}]   ;;  %s2565_s9 = inlined_call_operand.hbm [shape: f32[1,32], index: 9, kind: input, shape index: {}]   ;;  %s2566_s10 = inlined_call_operand.vmem [shape: bf16[32,32], index: 10, kind: input, shape index: {}]   ;;  %s2567_s11 = inlined_call_operand.vmem [shape: f32[1,32], index: 11, kind: input, shape index: {}]   ;;  %s2568_s12 = inlined_call_operand.vmem [shape: f32[1,32], index: 12, kind: input, shape index: {}]   ;;  %s2569_s13 = inlined_call_operand.vmem [shape: f32[1,32], index: 13, kind: input, shape index: {}]   ;;  %s2570_s14 = inlined_call_operand.hbm [shape: bf16[32,64], index: 14, kind: input, shape index: {}]   ;;  %s2571_s15 = inlined_call_operand.vmem [shape: f32[1,64], index: 15, kind: input, shape index: {}]   ;;  %s2572_s16 = inlined_call_operand.vmem [shape: bf16[64,32], index: 16, kind: input, shape index: {}]   ;;  %s2573_s17 = inlined_call_operand.vmem [shape: f32[1,32], index: 17, kind: input, shape index: {}]   ;;  %s2574_s18 = inlined_call_operand.hbm [shape: f32[16,32], index: 18, kind: output, shape index: {}]  }
   0x1   :  { %2576 = sst [smem:[#allocation24_spill]] %s2556_s0 }
   0x2   :  { %2577 = sst [smem:[#allocation25_spill]] %s2557_s1 }
   0x3   :  { %2578 = sst [smem:[#allocation26_spill]] %s2558_s2 }
   0x4   :  { %23 = vsyncpa [#allocation6], 0 }
   0x5   :  { %24 = vsyncpa [#allocation4], 0 }
   0x6   :  { %25 = vsyncpa [#allocation9], 0 }
   0x7   :  { %26 = vsyncpa [#allocation12], 0 }
   0x8   :  { %27 = vsyncpa [#allocation15], 0 }
   0x9   :  { %28 = vsyncpa [#allocation5], 0  ;;  %s2125_s27 = smov [#allocation8]   ;;  %s2126_s29 = smov [#allocation11]  }
   0xa   :  { %s55_s28 = sshll.u32 %s2125_s27, 4  ;;  %s79_s30 = sshll.u32 %s2126_s29, 4  ;;  %s56_s28 = int_to_ptr.vmem [resolvable:$true] %s55_s28  ;;  %s80_s30 = int_to_ptr.vmem [resolvable:$true] %s79_s30 }
   0xb   :  { %s1953_s0 = scalar_lea.vmem %s56_s28, 16  ;;  %s1957_s19 = scalar_lea.vmem %s56_s28, 32 }
   0xc   :  { %p1954_p0 = scmp.ne.s32.totalorder %s56_s28, %s1953_s0  ;;  %p1958_p1 = scmp.lt.s32.totalorder %s56_s28, %s56_s28 }
   0xd   :  { %p1959_p2 = scmp.lt.s32.totalorder %s1957_s19, %s1953_s0 }
   0xf   :  { %p1960_p3 = por %p1959_p2, %p1958_p1 }
  0x11   :  { %p1961_p4 = pnand %p1960_p3, %p1954_p0 }
  0x13   :  { %1964 = shalt.err (!%p1961_p4)
}
  0x14   :  { %58 = dma.hbm_to_vmem [thread:$0]  %s2559_s3, 16, %s56_s28, [#allocation9]  }
  0x15   :  { %s1973_s21 = scalar_lea.vmem %s80_s30, 16  ;;  %s1977_s22 = scalar_lea.vmem %s80_s30, 32 }
  0x16   :  { %p1974_p5 = scmp.ne.s32.totalorder %s80_s30, %s1973_s21  ;;  %p1978_p6 = scmp.lt.s32.totalorder %s80_s30, %s80_s30 }
  0x17   :  { %p1979_p7 = scmp.lt.s32.totalorder %s1977_s22, %s1973_s21 }
  0x19   :  { %p1980_p8 = por %p1979_p7, %p1978_p6 }
  0x1b   :  { %p1981_p9 = pnand %p1980_p8, %p1974_p5 }
  0x1d   :  { %1984 = shalt.err (!%p1981_p9)
}
  0x1e   :  { %82 = dma.hbm_to_vmem [thread:$0]  %s2563_s7, 16, %s80_s30, [#allocation12]  }
  0x1f   :  { %s2127_s24 = smov [#allocation14]   ;;  %s2128_s26 = smov [#allocation7]  }
  0x20   :  { %s101_s25 = sshll.u32 %s2127_s24, 4  ;;  %s45_s27 = sshll.u32 %s2128_s26, 4  ;;  %s102_s25 = int_to_ptr.vmem [resolvable:$true] %s101_s25  ;;  %s46_s27 = int_to_ptr.vmem [resolvable:$true] %s45_s27 }
  0x21   :  { %s1993_s29 = scalar_lea.vmem %s102_s25, 16  ;;  %s1997_s3 = scalar_lea.vmem %s102_s25, 32 }
  0x22   :  { %p1994_p10 = scmp.ne.s32.totalorder %s102_s25, %s1993_s29  ;;  %p1998_p11 = scmp.lt.s32.totalorder %s102_s25, %s102_s25 }
  0x23   :  { %p1999_p12 = scmp.lt.s32.totalorder %s1997_s3, %s1993_s29 }
  0x25   :  { %p2000_p13 = por %p1999_p12, %p1998_p11 }
  0x27   :  { %p2001_p0 = pnand %p2000_p13, %p1994_p10 }
  0x29   :  { %2004 = shalt.err (!%p2001_p0)
}
  0x2a   :  { %104 = dma.hbm_to_vmem [thread:$0]  %s2565_s9, 16, %s102_s25, [#allocation15]  }
  0x2b   :  { %s2129_s19 = smov [#allocation3]   ;;  %s2579_s30 = sld [smem:[#allocation24_spill]] }
  0x2c   :  { %s2021_s20 = scalar_lea.vmem %s46_s27, 16  ;;  %s2025_s21 = scalar_lea.vmem %s46_s27, 32 }
  0x2d   :  { %p2022_p1 = scmp.ne.s32.totalorder %s46_s27, %s2021_s20  ;;  %p2026_p2 = scmp.lt.s32.totalorder %s46_s27, %s46_s27 }
  0x2e   :  { %p2027_p3 = scmp.lt.s32.totalorder %s2025_s21, %s2021_s20 }
  0x30   :  { %p2028_p4 = por %p2027_p3, %p2026_p2 }
  0x31   :  { %36 = dma.hbm_to_smem %s2579_s30, 16, %s2129_s19, [#allocation6]  }
  0x32   :  { %p2029_p5 = pnand %p2028_p4, %p2022_p1 }
  0x34   :  { %2032 = shalt.err (!%p2029_p5)
}
  0x35   :  { %s2580_s23 = sld [smem:[#allocation26_spill]]  ;;  %s2130_s24 = smov [#allocation10]  }
  0x36   :  { %s67_s9 = sshll.u32 %s2130_s24, 4  ;;  %s2131_s25 = smov [#allocation13]   ;;  %s68_s9 = int_to_ptr.vmem [resolvable:$true] %s67_s9 }
  0x37   :  { %s88_s26 = sshll.u32 %s2131_s25, 4  ;;  %s2041_s29 = scalar_lea.vmem %s68_s9, 16  ;;  %s89_s26 = int_to_ptr.vmem [resolvable:$true] %s88_s26 }
  0x38   :  { %p2042_p6 = scmp.ne.s32.totalorder %s68_s9, %s2041_s29  ;;  %s2045_s3 = scalar_lea.vmem %s68_s9, 32 }
  0x39   :  { %p2046_p7 = scmp.lt.s32.totalorder %s68_s9, %s68_s9  ;;  %p2047_p8 = scmp.lt.s32.totalorder %s2045_s3, %s2041_s29 }
  0x3b   :  { %48 = dma.hbm_to_vmem [thread:$0]  %s2580_s23, 16, %s46_s27, [#allocation4]  }
  0x3c   :  { %p2048_p9 = por %p2047_p8, %p2046_p7 }
  0x3e   :  { %p2049_p10 = pnand %p2048_p9, %p2042_p6 }
  0x40   :  { %2052 = shalt.err (!%p2049_p10)
}
  0x41   :  { %70 = dma.hbm_to_vmem [thread:$0]  %s2561_s5, 16, %s68_s9, [#allocation9]  }
  0x42   :  { %s2061_s19 = scalar_lea.vmem %s89_s26, 256  ;;  %p2066_p12 = scmp.lt.s32.totalorder %s89_s26, %s89_s26 }
  0x43   :  { %p2062_p11 = scmp.ne.s32.totalorder %s89_s26, %s2061_s19  ;;  %p2067_p13 = scmp.lt.s32.totalorder %s2061_s19, %s2061_s19 }
  0x45   :  { %p2068_p0 = por %p2067_p13, %p2066_p12 }
  0x47   :  { %p2069_p1 = pnand %p2068_p0, %p2062_p11 }
  0x49   :  { %2072 = shalt.err (!%p2069_p1)
}
  0x4a   :  { %s2132_s27 = smov 64   ;;  %s2133_s1 = smov 4  }
  0x4b   :  { %94 = dma.hbm_to_vmem [thread:$0]  %s2564_s8, 256, %s89_s26, [#allocation12], %s2132_s27, %s2132_s27, %s2133_s1  }
  0x4c   :  { %s2134_s20 = smov [#allocation16]  }
  0x4d   :  { %s118_s21 = sshll.u32 %s2134_s20, 4  ;;  %s119_s21 = int_to_ptr.vmem [resolvable:$true] %s118_s21 }
  0x4e   :  { %s2081_s22 = scalar_lea.vmem %s119_s21, 256  ;;  %p2086_p3 = scmp.lt.s32.totalorder %s119_s21, %s119_s21 }
  0x4f   :  { %p2082_p2 = scmp.ne.s32.totalorder %s119_s21, %s2081_s22  ;;  %p2087_p4 = scmp.lt.s32.totalorder %s2081_s22, %s2081_s22 }
  0x51   :  { %p2088_p5 = por %p2087_p4, %p2086_p3 }
  0x53   :  { %p2089_p6 = pnand %p2088_p5, %p2082_p2 }
  0x55   :  { %2092 = shalt.err (!%p2089_p6)
}
  0x56   :  { %124 = dma.hbm_to_vmem [thread:$0]  %s2570_s14, 256, %s119_s21, [#allocation15], %s2132_s27, %s2132_s27, %s2133_s1  }
  0x57   :  { %2113 = dma.done.wait [#allocation6], 16  }
  0x58   :  { %2114 = vsyncadd [#allocation6], 4294967280 }
  0x59   :  { %2115 = dma.done.wait [#allocation4], 16  }
  0x5a   :  { %2116 = vsyncadd [#allocation4], 4294967280 }
  0x5b   :  { %2117 = dma.done.wait [#allocation9], 32  }
  0x5c   :  { %2118 = vsyncadd [#allocation9], 4294967264 }
  0x5d   :  { %2119 = dma.done.wait [#allocation12], 272  }
  0x5e   :  { %2120 = vsyncadd [#allocation12], 4294967024 }
  0x5f   :  { %2121 = dma.done.wait [#allocation15], 272  }
  0x60   :  { %2122 = vsyncadd [#allocation15], 4294967024 }
  0x61   :  { %155 = sfence }
  0x62   :  { %s2581_s24 = sld [smem:[#allocation25_spill]]  ;;  %vm161_vm0 = vcmask 261120   ;;  %v1891_v14 = vld [vmem:[%s2560_s4 + $0x8] sm:$0xff]   ;;  %v2135_v16 = vmov 0.0   ;;  %v1893_v17 = vld [vmem:[%s2560_s4] sm:$0xff]   ;;  %vm2136_vm1 = vmmov 0  }
  0x63   :  { %v1892_v15 = vld [vmem:[%s2562_s6 + $0x8] sm:$0xff]   ;;  %1723 = vmatprep.subr.bf16.mxu0 %v2135_v16  ;;  %1731 = vmatprep.subr.bf16.mxu1 %v2135_v16  ;;  %v1894_v18 = vld [vmem:[%s2562_s6] sm:$0xff]   ;;  %v1624_v27 = vld [vmem:[#allocation7] ss:$0 sm:$0xff]  ;;  %vm417_vm2 = vcmask 64512   ;;  %vm537_vm3 = vcmask 1043456  }
  0x64   :  { %1724 = vmatpush3.bf16.msra.mxu0 %v1891_v14  ;;  %1732 = vmatpush3.bf16.msra.mxu1 %v1892_v15  ;;  %v1625_v31 = vld [vmem:[#allocation8] ss:$0 sm:$0xff]  ;;  %v1895_v35 = vld [vmem:[#allocation13 + $0x8] sm:$0xff]   ;;  %v1896_v37 = vld [vmem:[#allocation13] sm:$0xff]   ;;  %s403_s4 = sld [smem:[#allocation3]]  ;;  %s2137_s1 = smov 120  }
  0x65   :  { %1725 = vmatprep.subr.bf16.mxu0 %v2135_v16  ;;  %1733 = vmatprep.subr.bf16.mxu1 %v2135_v16  ;;  %v1630_v38 = vld [vmem:[#allocation11] ss:$0 sm:$0xff]  ;;  %v1626_v45 = vld [vmem:[#allocation10] ss:$0 sm:$0xff]  ;;  %v1634_v52 = vld [vmem:[#allocation14] ss:$0 sm:$0xff] }
  0x66   :  { %1727 = vmatprep.mubr.msk.bf16.mxu0 %vm2136_vm1, %v2135_v16  ;;  %1735 = vmatprep.mubr.msk.bf16.mxu1 %vm2136_vm1, %v2135_v16  ;;  %s1638_s6 = sld [smem:[#allocation3 + $0x1]]  ;;  %s2138_s7 = smov 112   ;;  %vm863_vm6 = vcmask 130112   ;;  %vm1094_vm7 = vcmask 195712   ;;  %vm1325_vm8 = vcmask 261312   ;;  %vm1554_vm9 = vcmask 523264  }
  0x67   :  { %s2139_s30 = smov 104   ;;  %s2140_s20 = smov 8  }
  0x68   :  { %v2267_v0 = vld [vmem:[%s2581_s24] sm:$0xff]  ;;  %v2272_v1 = vld [vmem:[%s2581_s24 + $0x8] sm:$0xff]  ;;  %1726 = vmatpush3.bf16.msra.mxu0 %v1893_v17  ;;  %1734 = vmatpush3.bf16.msra.mxu1 %v1894_v18  ;;  %s2141_s21 = smov 16   ;;  %s2142_s23 = smov 24  }
  0x69   :  { %v162_v2 = vsel %vm161_vm0, %v2267_v0, 0.0  ;;  %v165_v3 = vsel %vm161_vm0, %v2272_v1, 0.0  ;;  %1739 = vmatprep.subr.bf16.mxu0 %v2135_v16  ;;  %1747 = vmatprep.subr.bf16.mxu1 %v2135_v16 }
  0x6a   :  { %163 = vadd.xlane.f32.xlu0 %v162_v2 }
  0x6e   :  { %166 = vadd.xlane.f32.xlu0 %v165_v3 }
  0xf3   :  { %v164_v4 = vpop.xlane.xlu0 %163 }
  0xf4   :  { %v169_v5 = vmul.f32 0.03125, %v164_v4 }
  0xf6   :  { %v171_v6 = vsub.f32 %v2267_v0, %v169_v5 }
  0xf7   :  { %v167_v7 = vpop.xlane.xlu0 %166 }
  0xf8   :  { %v170_v8 = vmul.f32 0.03125, %v167_v7  ;;  %v173_v9 = vmul.f32 %v171_v6, %v171_v6  ;;  %v401_v7 = vlaneseq }
  0xfa   :  { %v172_v10 = vsub.f32 %v2272_v1, %v170_v8  ;;  %v175_v11 = vsel %vm161_vm0, %v173_v9, 0.0  ;;  %v402_v8 = vand.u32 127, %v401_v7  ;;  %v404_v9 = vstv %s403_s4 }
  0xfb   :  { %176 = vadd.xlane.f32.xlu1 %v175_v11 }
  0xfc   :  { %v174_v12 = vmul.f32 %v172_v10, %v172_v10  ;;  %vm405_vm4 = vcmp.ge.s32.totalorder %v402_v8, %v404_v9 }
  0xfd   :  { %v2348_v11 = vsel %vm405_vm4, -1e+18, %v2135_v16 }
  0xfe   :  { %v178_v13 = vsel %vm161_vm0, %v174_v12, 0.0 }
  0xff   :  { %179 = vadd.xlane.f32.xlu1 %v178_v13 }
 0x184   :  { %v177_v19 = vpop.xlane.xlu1 %176 }
 0x185   :  { %v181_v20 = vmul.f32 0.03125, %v177_v19 }
 0x187   :  { %v183_v21 = vadd.f32 1e-06, %v181_v20 }
 0x188   :  { %v180_v22 = vpop.xlane.xlu1 %179 }
 0x189   :  { %1905 = vrsqrt.f32 %v183_v21  ;;  %v182_v23 = vmul.f32 0.03125, %v180_v22 }
 0x18b   :  { %v184_v24 = vadd.f32 1e-06, %v182_v23 }
 0x18d   :  { %1907 = vrsqrt.f32 %v184_v24 }
 0x196   :  { %v1906_v25 = vpop.eup %1905 }
 0x197   :  { %v187_v26 = vmul.f32 %v1906_v25, %v171_v6 }
 0x199   :  { %v195_v30 = vmul.f32 %v1624_v27, %v187_v26 }
 0x19a   :  { %v1908_v28 = vpop.eup %1907 }
 0x19b   :  { %v188_v29 = vmul.f32 %v1908_v28, %v172_v10  ;;  %v203_v33 = vadd.f32 %v1625_v31, %v195_v30  ;;  %v408_v10 = vstv %s1638_s6 }
 0x19c   :  { %vm409_vm5 = vcmp.ge.s32.totalorder %v402_v8, %v408_v10 }
 0x19d   :  { %v196_v32 = vmul.f32 %v1624_v27, %v188_v29  ;;  %v2352_v15 = vsel %vm409_vm5, -1e+18, %v2135_v16 }
 0x19f   :  { %v204_v34 = vadd.f32 %v1625_v31, %v196_v32 }
 0x1a1   :  { %v205_v36 = vpack.c.bf16 %v204_v34, %v203_v33 }
 0x1a3   :  { %1728 = vmatmul.mubr.msk.bf16.vlgmr.msra.gmra.mxu0 %vm161_vm0, %v205_v36  ;;  %1736 = vmatmul.mubr.msk.bf16.vlgmr.msra.gmra.mxu1 %vm161_vm0, %v205_v36 }
 0x1a4   :  { %1740 = vmatpush3.bf16.msra.mxu0 %v1895_v35  ;;  %1743 = vmatprep.mubr.msk.bf16.mxu0 %vm2136_vm1, %v2135_v16 }
 0x1a5   :  { %1741 = vmatprep.subr.bf16.mxu0 %v2135_v16  ;;  %1749 = vmatprep.mubr.msk.bf16.mxu1 %vm2136_vm1, %v2135_v16 }
 0x1a8   :  { %1742 = vmatpush3.bf16.msra.mxu0 %v1896_v37 }
 0x1a9   :  { %1753 = vmatprep.subr.bf16.mxu0 %v2135_v16 }
 0x1ab   :  { %1744 = vmatmul.mubr.msk.bf16.vlgmr.msra.gmra.mxu0 %vm161_vm0, %v205_v36 }
 0x1ac   :  { %1755 = vmatprep.mubr.msk.bf16.mxu0 %vm2136_vm1, %v2135_v16 }
 0x263   :  { %v266_v39 = vpop.f32.mrf.mxu0  ;;  %v330_v40 = vpop.f32.mrf.mxu1 }
 0x264   :  { %v331_v41 = vadd.f32 %v1630_v38, %v330_v40  ;;  %v267_v53 = vadd.f32 %v1626_v45, %v266_v39 }
 0x265   :  { %v1729_v42 = vpop.f32.mrf.mxu0  ;;  %v1737_v43 = vpop.f32.mrf.mxu1 }
 0x266   :  { %v2315_v44 = vpack.c.bf16 %v331_v41, %v331_v41  ;;  %v2324_v59 = vpack.c.bf16 %v267_v53, %v267_v53 }
 0x267   :  { %v269_v46 = vpop.f32.mrf.mxu0  ;;  %v333_v47 = vpop.f32.mrf.mxu1 }
 0x268   :  { %v334_v48 = vadd.f32 %v1630_v38, %v333_v47  ;;  %v422_v49 = vsel %vm417_vm2, %v2315_v44, 0  ;;  %v270_v60 = vadd.f32 %v1626_v45, %v269_v46 }
 0x269   :  { %v1730_v50 = vpop.f32.mrf.mxu0  ;;  %v1738_v51 = vpop.f32.mrf.mxu1  ;;  %1748 = vmatpush3.bf16.xpose.msra.mxu1 %v422_v49 }
 0x26a   :  { %v2319_v54 = vpack.c.bf16 %v334_v48, %v334_v48  ;;  %1759 = vmatprep.subr.bf16.mxu1 %v2135_v16  ;;  %v2335_v4 = vpack.c.bf16 %v270_v60, %v270_v60 }
 0x26b   :  { %v394_v55 = vpop.f32.mrf.mxu0 }
 0x26c   :  { %v395_v56 = vadd.f32 %v1634_v52, %v394_v55  ;;  %v468_v57 = vsel %vm417_vm2, %v2319_v54, 0 }
 0x26d   :  { %v1745_v58 = vpop.f32.mrf.mxu0  ;;  %1754 = vmatpush3.bf16.xpose.msra.mxu0 %v468_v57 }
 0x26e   :  { %v2326_v61 = vpack.c.bf16 %v395_v56, %v395_v56  ;;  %1765 = vmatprep.subr.bf16.mxu0 %v2135_v16 }
 0x26f   :  { %v397_v62 = vpop.f32.mrf.mxu0 }
 0x270   :  { %v398_v63 = vadd.f32 %v1634_v52, %v397_v62  ;;  %1750 = vmatmul.mubr.msk.bf16.vlgmr.msra.gmra.mxu1 %vm417_vm2, %v2324_v59  ;;  %v539_v2 = vsel %vm537_vm3, %v2326_v61, 0 }
 0x271   :  { %v1746_v3 = vpop.f32.mrf.mxu0  ;;  %1760 = vmatpush3.bf16.msra.mxu1 %v539_v2  ;;  %1761 = vmatprep.mubr.msk.bf16.mxu1 %vm2136_vm1, %v2135_v16 }
 0x272   :  { %v2337_v5 = vpack.c.bf16 %v398_v63, %v398_v63  ;;  %1771 = vmatprep.subr.bf16.mxu1 %v2135_v16 }
 0x274   :  { %1756 = vmatmul.mubr.msk.bf16.vlgmr.msra.gmra.mxu0 %vm417_vm2, %v2335_v4  ;;  %v585_v6 = vsel %vm537_vm3, %v2337_v5, 0 }
 0x275   :  { %1766 = vmatpush3.bf16.msra.mxu0 %v585_v6  ;;  %1767 = vmatprep.mubr.msk.bf16.mxu0 %vm2136_vm1, %v2135_v16 }
 0x276   :  { %1777 = vmatprep.subr.bf16.mxu0 %v2135_v16 }
 0x330   :  { %v458_v12 = vpop.f32.mrf.mxu1 }
 0x331   :  { %v459_v13 = vadd.f32 %v458_v12, %v2348_v11 }
 0x332   :  { %v1751_v14 = vpop.f32.mrf.mxu1 }
 0x333   :  { %v510_v17 = vsel %vm417_vm2, %v459_v13, -inf }
 0x334   :  { %511 = vmax.xlane.f32.xlu0 %v510_v17  ;;  %v461_v18 = vpop.f32.mrf.mxu1  ;;  %v504_v19 = vpop.f32.mrf.mxu0 }
 0x335   :  { %v505_v20 = vadd.f32 %v504_v19, %v2352_v15 }
 0x336   :  { %v1752_v21 = vpop.f32.mrf.mxu1  ;;  %v1757_v22 = vpop.f32.mrf.mxu0 }
 0x337   :  { %v513_v23 = vsel %vm417_vm2, %v505_v20, -inf }
 0x338   :  { %514 = vmax.xlane.f32.xlu1 %v513_v23  ;;  %v507_v24 = vpop.f32.mrf.mxu0 }
 0x33a   :  { %v1758_v25 = vpop.f32.mrf.mxu0 }
 0x349   :  { %685 = vrot.lane.b32.xlu1 %v2319_v54, %s2137_s1 }
 0x3bd   :  { %v512_v26 = vpop.xlane.xlu0 %511 }
 0x3be   :  { %v516_v27 = vsub.f32 %v459_v13, %v512_v26 }
 0x3c0   :  { %v518_v28 = vmul.f32 1.442695, %v516_v27 }
 0x3c1   :  { %v515_v29 = vpop.xlane.xlu1 %514 }
 0x3c2   :  { %1909 = vpow2.f32 %v518_v28  ;;  %v517_v30 = vsub.f32 %v505_v20, %v515_v29 }
 0x3c4   :  { %v520_v31 = vmul.f32 1.442695, %v517_v30 }
 0x3c5   :  { %v686_v36 = vpop.permute.xlu1 %685 }
 0x3c6   :  { %1911 = vpow2.f32 %v520_v31  ;;  %v691_v48 = vsel %vm417_vm2, %v686_v36, 0 }
 0x3cf   :  { %v1910_v32 = vpop.eup %1909 }
 0x3d0   :  { %v522_v33 = vsel %vm417_vm2, %v1910_v32, 0.0 }
 0x3d1   :  { %523 = vadd.xlane.f32.xlu0 %v522_v33 }
 0x3d3   :  { %v1912_v34 = vpop.eup %1911 }
 0x3d4   :  { %v525_v35 = vsel %vm417_vm2, %v1912_v34, 0.0 }
 0x3d5   :  { %526 = vadd.xlane.f32.xlu1 %v525_v35 }
 0x3e6   :  { %630 = vrot.lane.b32.xlu1 %v2324_v59, %s2137_s1 }
 0x3e7   :  { %633 = vrot.lane.b32.xlu0 %v2315_v44, %s2137_s1 }
 0x3ea   :  { %682 = vrot.lane.b32.xlu1 %v2335_v4, %s2137_s1 }
 0x45a   :  { %v524_v37 = vpop.xlane.xlu0 %523 }
 0x45b   :  { %1913 = vrcp.f32 %v524_v37 }
 0x45e   :  { %v527_v38 = vpop.xlane.xlu1 %526  ;;  %v634_v41 = vpop.permute.xlu0 %633 }
 0x45f   :  { %1915 = vrcp.f32 %v527_v38  ;;  %v639_v45 = vsel %vm417_vm2, %v634_v41, 0 }
 0x462   :  { %v631_v49 = vpop.permute.xlu1 %630 }
 0x466   :  { %v683_v50 = vpop.permute.xlu1 %682 }
 0x468   :  { %v1914_v39 = vpop.eup %1913 }
 0x469   :  { %v530_v40 = vmul.f32 %v1914_v39, %v1910_v32 }
 0x46b   :  { %v532_v42 = vpack.c.bf16 %v530_v40, %v530_v40 }
 0x46c   :  { %v1916_v43 = vpop.eup %1915 }
 0x46d   :  { %1762 = vmatmul.mubr.msk.bf16.vlgmr.msra.gmra.mxu1 %vm417_vm2, %v532_v42  ;;  %v531_v46 = vmul.f32 %v1916_v43, %v1912_v34 }
 0x46e   :  { %1772 = vmatpush3.bf16.xpose.msra.mxu1 %v639_v45  ;;  %1773 = vmatprep.mubr.msk.bf16.mxu1 %vm2136_vm1, %v2135_v16 }
 0x46f   :  { %v533_v47 = vpack.c.bf16 %v531_v46, %v531_v46  ;;  %1783 = vmatprep.subr.bf16.mxu1 %v2135_v16 }
 0x471   :  { %1768 = vmatmul.mubr.msk.bf16.vlgmr.msra.gmra.mxu0 %vm417_vm2, %v533_v47 }
 0x472   :  { %1778 = vmatpush3.bf16.xpose.msra.mxu0 %v691_v48  ;;  %1779 = vmatprep.mubr.msk.bf16.mxu0 %vm2136_vm1, %v2135_v16 }
 0x473   :  { %1789 = vmatprep.subr.bf16.mxu0 %v2135_v16 }
 0x475   :  { %1774 = vmatmul.mubr.msk.bf16.vlgmr.msra.gmra.mxu1 %vm417_vm2, %v631_v49 }
 0x476   :  { %1785 = vmatprep.mubr.msk.bf16.mxu1 %vm2136_vm1, %v2135_v16 }
 0x479   :  { %1780 = vmatmul.mubr.msk.bf16.vlgmr.msra.gmra.mxu0 %vm417_vm2, %v683_v50 }
 0x47a   :  { %1791 = vmatprep.mubr.msk.bf16.mxu0 %vm2136_vm1, %v2135_v16 }
 0x52d   :  { %v575_v51 = vpop.f32.mrf.mxu1 }
 0x52e   :  { %627 = vst.msk [vmem:[#allocation2] sm:$0xff] %vm417_vm2, %v575_v51 }
 0x52f   :  { %v1763_v52 = vpop.f32.mrf.mxu1 }
 0x531   :  { %v578_v53 = vpop.f32.mrf.mxu1  ;;  %v621_v55 = vpop.f32.mrf.mxu0 }
 0x532   :  { %628 = vst.msk [vmem:[#allocation2 + $0x8] sm:$0xff] %vm417_vm2, %v621_v55 }
 0x533   :  { %v1764_v56 = vpop.f32.mrf.mxu1  ;;  %v1769_v57 = vpop.f32.mrf.mxu0 }
 0x535   :  { %v624_v58 = vpop.f32.mrf.mxu0  ;;  %v675_v60 = vpop.f32.mrf.mxu1 }
 0x536   :  { %v676_v62 = vadd.f32 %v675_v60, %v2348_v11 }
 0x537   :  { %v1770_v63 = vpop.f32.mrf.mxu0  ;;  %v1775_v2 = vpop.f32.mrf.mxu1 }
 0x538   :  { %v733_v3 = vsel %vm417_vm2, %v676_v62, -inf }
 0x539   :  { %734 = vmax.xlane.f32.xlu0 %v733_v3  ;;  %v678_v6 = vpop.f32.mrf.mxu1  ;;  %v727_v7 = vpop.f32.mrf.mxu0 }
 0x53a   :  { %v728_v8 = vadd.f32 %v727_v7, %v2352_v15 }
 0x53b   :  { %v1776_v9 = vpop.f32.mrf.mxu1  ;;  %v1781_v10 = vpop.f32.mrf.mxu0 }
 0x53c   :  { %v736_v12 = vsel %vm417_vm2, %v728_v8, -inf }
 0x53d   :  { %737 = vmax.xlane.f32.xlu1 %v736_v12  ;;  %v730_v13 = vpop.f32.mrf.mxu0 }
 0x53f   :  { %v1782_v14 = vpop.f32.mrf.mxu0 }
 0x54e   :  { %807 = vrot.lane.b32.xlu1 %v2337_v5, %s2137_s1 }
 0x552   :  { %868 = vrot.lane.b32.xlu1 %v2315_v44, %s2138_s7 }
 0x556   :  { %918 = vrot.lane.b32.xlu1 %v2319_v54, %s2138_s7 }
 0x55a   :  { %916 = vrot.lane.b32.xlu1 %v2335_v4, %s2138_s7 }
 0x5c2   :  { %v735_v17 = vpop.xlane.xlu0 %734 }
 0x5c3   :  { %v739_v18 = vsub.f32 %v676_v62, %v735_v17 }
 0x5c5   :  { %v741_v19 = vmul.f32 1.442695, %v739_v18 }
 0x5c6   :  { %v738_v20 = vpop.xlane.xlu1 %737 }
 0x5c7   :  { %1917 = vpow2.f32 %v741_v19  ;;  %v740_v21 = vsub.f32 %v728_v8, %v738_v20 }
 0x5c9   :  { %v743_v22 = vmul.f32 1.442695, %v740_v21 }
 0x5ca   :  { %v808_v23 = vpop.permute.xlu1 %807 }
 0x5cb   :  { %1919 = vpow2.f32 %v743_v22  ;;  %v813_v24 = vsel %vm537_vm3, %v808_v23, 0 }
 0x5cc   :  { %1790 = vmatpush3.bf16.msra.mxu0 %v813_v24 }
 0x5cd   :  { %1801 = vmatprep.subr.bf16.mxu0 %v2135_v16 }
 0x5ce   :  { %v869_v34 = vpop.permute.xlu1 %868 }
 0x5cf   :  { %v874_v38 = vsel %vm417_vm2, %v869_v34, 0 }
 0x5d2   :  { %v919_v40 = vpop.permute.xlu1 %918 }
 0x5d3   :  { %v924_v42 = vsel %vm417_vm2, %v919_v40, 0 }
 0x5d4   :  { %v1918_v25 = vpop.eup %1917 }
 0x5d5   :  { %v745_v26 = vsel %vm417_vm2, %v1918_v25, 0.0 }
 0x5d6   :  { %746 = vadd.xlane.f32.xlu0 %v745_v26  ;;  %v917_v45 = vpop.permute.xlu1 %916 }
 0x5d8   :  { %v1920_v27 = vpop.eup %1919 }
 0x5d9   :  { %v748_v28 = vsel %vm417_vm2, %v1920_v27, 0.0 }
 0x5da   :  { %749 = vadd.xlane.f32.xlu0 %v748_v28 }
 0x5f0   :  { %758 = vrot.lane.b32.xlu0 %v2326_v61, %s2137_s1 }
 0x5f4   :  { %866 = vrot.lane.b32.xlu0 %v2324_v59, %s2138_s7 }
 0x65f   :  { %v747_v29 = vpop.xlane.xlu0 %746 }
 0x660   :  { %1921 = vrcp.f32 %v747_v29 }
 0x663   :  { %v750_v30 = vpop.xlane.xlu0 %749 }
 0x664   :  { %1923 = vrcp.f32 %v750_v30 }
 0x667   :  { %v759_v31 = vpop.permute.xlu0 %758 }
 0x668   :  { %v764_v32 = vsel %vm537_vm3, %v759_v31, 0 }
 0x669   :  { %1784 = vmatpush3.bf16.msra.mxu1 %v764_v32 }
 0x66a   :  { %1795 = vmatprep.subr.bf16.mxu1 %v2135_v16 }
 0x66b   :  { %v867_v43 = vpop.permute.xlu0 %866 }
 0x66d   :  { %v1922_v33 = vpop.eup %1921 }
 0x66e   :  { %v753_v35 = vmul.f32 %v1922_v33, %v1918_v25 }
 0x670   :  { %v755_v36 = vpack.c.bf16 %v753_v35, %v753_v35 }
 0x671   :  { %v1924_v37 = vpop.eup %1923 }
 0x672   :  { %1786 = vmatmul.mubr.msk.bf16.vlgmr.msra.gmra.mxu1 %vm417_vm2, %v755_v36  ;;  %v754_v39 = vmul.f32 %v1924_v37, %v1920_v27 }
 0x673   :  { %1796 = vmatpush3.bf16.xpose.msra.mxu1 %v874_v38  ;;  %1797 = vmatprep.mubr.msk.bf16.mxu1 %vm2136_vm1, %v2135_v16 }
 0x674   :  { %v756_v41 = vpack.c.bf16 %v754_v39, %v754_v39  ;;  %1807 = vmatprep.subr.bf16.mxu1 %v2135_v16 }
 0x676   :  { %1792 = vmatmul.mubr.msk.bf16.vlgmr.msra.gmra.mxu0 %vm417_vm2, %v756_v41 }
 0x677   :  { %1802 = vmatpush3.bf16.xpose.msra.mxu0 %v924_v42  ;;  %1803 = vmatprep.mubr.msk.bf16.mxu0 %vm2136_vm1, %v2135_v16 }
 0x678   :  { %1813 = vmatprep.subr.bf16.mxu0 %v2135_v16 }
 0x67a   :  { %1798 = vmatmul.mubr.msk.bf16.vlgmr.msra.gmra.mxu1 %vm417_vm2, %v867_v43 }
 0x67b   :  { %1809 = vmatprep.mubr.msk.bf16.mxu1 %vm2136_vm1, %v2135_v16 }
 0x67e   :  { %1804 = vmatmul.mubr.msk.bf16.vlgmr.msra.gmra.mxu0 %vm417_vm2, %v917_v45 }
 0x67f   :  { %1815 = vmatprep.mubr.msk.bf16.mxu0 %vm2136_vm1, %v2135_v16 }
 0x732   :  { %v2423_v46 = vpop.f32.mrf.mxu1 }
 0x734   :  { %v1787_v47 = vpop.f32.mrf.mxu1 }
 0x736   :  { %v803_v48 = vpop.f32.mrf.mxu1  ;;  %v2425_v49 = vpop.f32.mrf.mxu0 }
 0x738   :  { %v1788_v50 = vpop.f32.mrf.mxu1  ;;  %v1793_v51 = vpop.f32.mrf.mxu0 }
 0x73a   :  { %v852_v52 = vpop.f32.mrf.mxu0  ;;  %v910_v53 = vpop.f32.mrf.mxu1 }
 0x73b   :  { %v911_v55 = vadd.f32 %v910_v53, %v2348_v11 }
 0x73c   :  { %v1794_v56 = vpop.f32.mrf.mxu0  ;;  %v1799_v57 = vpop.f32.mrf.mxu1 }
 0x73d   :  { %v966_v58 = vsel %vm417_vm2, %v911_v55, -inf }
 0x73e   :  { %967 = vmax.xlane.f32.xlu0 %v966_v58  ;;  %v913_v60 = vpop.f32.mrf.mxu1  ;;  %v960_v62 = vpop.f32.mrf.mxu0 }
 0x73f   :  { %v961_v63 = vadd.f32 %v960_v62, %v2352_v15 }
 0x740   :  { %v1800_v2 = vpop.f32.mrf.mxu1  ;;  %v1805_v3 = vpop.f32.mrf.mxu0 }
 0x741   :  { %v969_v6 = vsel %vm417_vm2, %v961_v63, -inf }
 0x742   :  { %970 = vmax.xlane.f32.xlu1 %v969_v6  ;;  %v963_v7 = vpop.f32.mrf.mxu0 }
 0x744   :  { %v1806_v8 = vpop.f32.mrf.mxu0 }
 0x753   :  { %1038 = vrot.lane.b32.xlu1 %v2337_v5, %s2138_s7 }
 0x757   :  { %1099 = vrot.lane.b32.xlu1 %v2315_v44, %s2139_s30 }
 0x75b   :  { %1149 = vrot.lane.b32.xlu1 %v2319_v54, %s2139_s30 }
 0x75f   :  { %1147 = vrot.lane.b32.xlu1 %v2335_v4, %s2139_s30 }
 0x7c7   :  { %v968_v9 = vpop.xlane.xlu0 %967 }
 0x7c8   :  { %v972_v10 = vsub.f32 %v911_v55, %v968_v9 }
 0x7ca   :  { %v974_v12 = vmul.f32 1.442695, %v972_v10 }
 0x7cb   :  { %v971_v13 = vpop.xlane.xlu1 %970 }
 0x7cc   :  { %1925 = vpow2.f32 %v974_v12  ;;  %v973_v14 = vsub.f32 %v961_v63, %v971_v13 }
 0x7ce   :  { %v976_v17 = vmul.f32 1.442695, %v973_v14 }
 0x7cf   :  { %v1039_v18 = vpop.permute.xlu1 %1038 }
 0x7d0   :  { %1927 = vpow2.f32 %v976_v17  ;;  %v1044_v19 = vsel %vm537_vm3, %v1039_v18, 0 }
 0x7d1   :  { %1814 = vmatpush3.bf16.msra.mxu0 %v1044_v19 }
 0x7d2   :  { %1825 = vmatprep.subr.bf16.mxu0 %v2135_v16 }
 0x7d3   :  { %v1100_v26 = vpop.permute.xlu1 %1099 }
 0x7d4   :  { %v1105_v30 = vsel %vm417_vm2, %v1100_v26, 0 }
 0x7d7   :  { %v1150_v31 = vpop.permute.xlu1 %1149 }
 0x7d8   :  { %v1155_v33 = vsel %vm417_vm2, %v1150_v31, 0 }
 0x7d9   :  { %v1926_v44 = vpop.eup %1925 }
 0x7da   :  { %v978_v54 = vsel %vm417_vm2, %v1926_v44, 0.0 }
 0x7db   :  { %979 = vadd.xlane.f32.xlu0 %v978_v54  ;;  %v1148_v35 = vpop.permute.xlu1 %1147 }
 0x7dd   :  { %v1928_v20 = vpop.eup %1927 }
 0x7de   :  { %v981_v4 = vsel %vm417_vm2, %v1928_v20, 0.0 }
 0x7df   :  { %982 = vadd.xlane.f32.xlu0 %v981_v4 }
 0x7f5   :  { %990 = vrot.lane.b32.xlu0 %v2326_v61, %s2138_s7 }
 0x7f9   :  { %1097 = vrot.lane.b32.xlu0 %v2324_v59, %s2139_s30 }
 0x864   :  { %v980_v21 = vpop.xlane.xlu0 %979 }
 0x865   :  { %1929 = vrcp.f32 %v980_v21 }
 0x868   :  { %v983_v22 = vpop.xlane.xlu0 %982 }
 0x869   :  { %1931 = vrcp.f32 %v983_v22  ;;  %v1897_v22 = vld [vmem:[%s2566_s10 + $0x8] sm:$0xff]  }
 0x86c   :  { %v991_v23 = vpop.permute.xlu0 %990 }
 0x86d   :  { %v996_v24 = vsel %vm537_vm3, %v991_v23, 0  ;;  %v1898_v23 = vld [vmem:[%s2566_s10] sm:$0xff]  }
 0x86e   :  { %1808 = vmatpush3.bf16.msra.mxu1 %v996_v24 }
 0x86f   :  { %1819 = vmatprep.subr.bf16.mxu1 %v2135_v16 }
 0x870   :  { %v1098_v34 = vpop.permute.xlu0 %1097 }
 0x872   :  { %v1930_v25 = vpop.eup %1929 }
 0x873   :  { %v986_v27 = vmul.f32 %v1930_v25, %v1926_v44 }
 0x875   :  { %v988_v28 = vpack.c.bf16 %v986_v27, %v986_v27 }
 0x876   :  { %v1932_v29 = vpop.eup %1931 }
 0x877   :  { %1810 = vmatmul.mubr.msk.bf16.vlgmr.msra.gmra.mxu1 %vm417_vm2, %v988_v28  ;;  %v987_v59 = vmul.f32 %v1932_v29, %v1928_v20 }
 0x878   :  { %1820 = vmatpush3.bf16.xpose.msra.mxu1 %v1105_v30  ;;  %1821 = vmatprep.mubr.msk.bf16.mxu1 %vm2136_vm1, %v2135_v16 }
 0x879   :  { %v989_v32 = vpack.c.bf16 %v987_v59, %v987_v59  ;;  %1831 = vmatprep.subr.bf16.mxu1 %v2135_v16 }
 0x87b   :  { %1816 = vmatmul.mubr.msk.bf16.vlgmr.msra.gmra.mxu0 %vm417_vm2, %v989_v32 }
 0x87c   :  { %1826 = vmatpush3.bf16.xpose.msra.mxu0 %v1155_v33  ;;  %1827 = vmatprep.mubr.msk.bf16.mxu0 %vm2136_vm1, %v2135_v16 }
 0x87d   :  { %1837 = vmatprep.subr.bf16.mxu0 %v2135_v16 }
 0x87f   :  { %1822 = vmatmul.mubr.msk.bf16.vlgmr.msra.gmra.mxu1 %vm417_vm2, %v1098_v34 }
 0x880   :  { %1833 = vmatprep.mubr.msk.bf16.mxu1 %vm2136_vm1, %v2135_v16 }
 0x883   :  { %1828 = vmatmul.mubr.msk.bf16.vlgmr.msra.gmra.mxu0 %vm417_vm2, %v1148_v35 }
 0x884   :  { %1839 = vmatprep.mubr.msk.bf16.mxu0 %vm2136_vm1, %v2135_v16 }
 0x937   :  { %v1032_v36 = vpop.f32.mrf.mxu1 }
 0x939   :  { %v1811_v37 = vpop.f32.mrf.mxu1 }
 0x93b   :  { %v1035_v38 = vpop.f32.mrf.mxu1  ;;  %v1080_v39 = vpop.f32.mrf.mxu0 }
 0x93d   :  { %v1812_v40 = vpop.f32.mrf.mxu1  ;;  %v1817_v41 = vpop.f32.mrf.mxu0 }
 0x93f   :  { %v1083_v42 = vpop.f32.mrf.mxu0  ;;  %v1141_v43 = vpop.f32.mrf.mxu1 }
 0x940   :  { %v1142_v45 = vadd.f32 %v1141_v43, %v2348_v11 }
 0x941   :  { %v1818_v47 = vpop.f32.mrf.mxu0  ;;  %v1823_v48 = vpop.f32.mrf.mxu1 }
 0x942   :  { %v1197_v50 = vsel %vm417_vm2, %v1142_v45, -inf }
 0x943   :  { %1198 = vmax.xlane.f32.xlu0 %v1197_v50  ;;  %v1144_v51 = vpop.f32.mrf.mxu1  ;;  %v1191_v52 = vpop.f32.mrf.mxu0 }
 0x944   :  { %v1192_v53 = vadd.f32 %v1191_v52, %v2352_v15 }
 0x945   :  { %v1824_v55 = vpop.f32.mrf.mxu1  ;;  %v1829_v56 = vpop.f32.mrf.mxu0 }
 0x946   :  { %v1200_v57 = vsel %vm417_vm2, %v1192_v53, -inf }
 0x947   :  { %1201 = vmax.xlane.f32.xlu1 %v1200_v57  ;;  %v1194_v58 = vpop.f32.mrf.mxu0 }
 0x949   :  { %v1830_v60 = vpop.f32.mrf.mxu0 }
 0x94a   :  { %v1899_v60 = vld [vmem:[#allocation16 + $0x8] sm:$0xff]  }
 0x958   :  { %1269 = vrot.lane.b32.xlu1 %v2337_v5, %s2139_s30 }
 0x95c   :  { %857 = vrot.lane.b32.xlu1 %v2423_v46, %s2140_s20 }
 0x960   :  { %859 = vrot.lane.b32.xlu1 %v2425_v49, %s2140_s20 }
 0x964   :  { %1090 = vrot.lane.b32.xlu1 %v1080_v39, %s2141_s21 }
 0x9cc   :  { %v1199_v11 = vpop.xlane.xlu0 %1198 }
 0x9cd   :  { %v1203_v15 = vsub.f32 %v1142_v45, %v1199_v11  ;;  %v1900_v11 = vld [vmem:[#allocation16] sm:$0xff]  }
 0x9cf   :  { %v1205_v62 = vmul.f32 1.442695, %v1203_v15  ;;  %v1901_v15 = vld [vmem:[%s2572_s16 + $0x18] sm:$0xff]  }
 0x9d0   :  { %v1202_v63 = vpop.xlane.xlu1 %1201 }
 0x9d1   :  { %1933 = vpow2.f32 %v1205_v62  ;;  %v1204_v2 = vsub.f32 %v1192_v53, %v1202_v63 }
 0x9d3   :  { %v1207_v3 = vmul.f32 1.442695, %v1204_v2 }
 0x9d4   :  { %v1270_v6 = vpop.permute.xlu1 %1269 }
 0x9d5   :  { %1935 = vpow2.f32 %v1207_v3  ;;  %v1275_v5 = vsel %vm537_vm3, %v1270_v6, 0 }
 0x9d6   :  { %1838 = vmatpush3.bf16.msra.mxu0 %v1275_v5 }
 0x9d7   :  { %1851 = vmatprep.subr.bf16.mxu0 %v2135_v16 }
 0x9d8   :  { %v858_v46 = vpop.permute.xlu1 %857 }
 0x9d9   :  { %864 = vst.msk [vmem:[#allocation2] sm:$0xff] %vm863_vm6, %v858_v46 }
 0x9dc   :  { %v860_v49 = vpop.permute.xlu1 %859 }
 0x9dd   :  { %865 = vst.msk [vmem:[#allocation2 + $0x8] sm:$0xff] %vm863_vm6, %v860_v49 }
 0x9de   :  { %v1934_v7 = vpop.eup %1933 }
 0x9df   :  { %v1209_v8 = vsel %vm417_vm2, %v1934_v7, 0.0 }
 0x9e0   :  { %1210 = vadd.xlane.f32.xlu0 %v1209_v8  ;;  %v1091_v9 = vpop.permute.xlu1 %1090 }
 0x9e1   :  { %1096 = vst.msk [vmem:[#allocation2 + $0x8] sm:$0xff] %vm1094_vm7, %v1091_v9 }
 0x9e2   :  { %v1936_v10 = vpop.eup %1935 }
 0x9e3   :  { %v1212_v12 = vsel %vm417_vm2, %v1936_v10, 0.0 }
 0x9e4   :  { %1213 = vadd.xlane.f32.xlu0 %v1212_v12  ;;  %v1660_v12 = vld [vmem:[%s2569_s13] ss:$0 sm:$0xff] }
 0x9fa   :  { %1221 = vrot.lane.b32.xlu0 %v2326_v61, %s2139_s30 }
 0x9fe   :  { %1088 = vrot.lane.b32.xlu0 %v1032_v36, %s2141_s21  ;;  %v1655_v36 = vld [vmem:[%s2567_s11] ss:$0 sm:$0xff] }
 0xa69   :  { %v1211_v13 = vpop.xlane.xlu0 %1210 }
 0xa6a   :  { %1937 = vrcp.f32 %v1211_v13 }
 0xa6d   :  { %v1214_v14 = vpop.xlane.xlu0 %1213 }
 0xa6e   :  { %1939 = vrcp.f32 %v1214_v14 }
 0xa71   :  { %v1222_v17 = vpop.permute.xlu0 %1221 }
 0xa72   :  { %v1227_v18 = vsel %vm537_vm3, %v1222_v17, 0 }
 0xa73   :  { %1832 = vmatpush3.bf16.msra.mxu1 %v1227_v18 }
 0xa74   :  { %1843 = vmatprep.subr.bf16.mxu1 %v2135_v16 }
 0xa75   :  { %v1089_v19 = vpop.permute.xlu0 %1088 }
 0xa76   :  { %1095 = vst.msk [vmem:[#allocation2] sm:$0xff] %vm1094_vm7, %v1089_v19  ;;  %v1902_v19 = vld [vmem:[%s2572_s16 + $0x10] sm:$0xff]  }
 0xa77   :  { %v1938_v44 = vpop.eup %1937 }
 0xa78   :  { %v1217_v54 = vmul.f32 %v1938_v44, %v1934_v7  ;;  %v1659_v7 = vld [vmem:[%s2568_s12] ss:$0 sm:$0xff]  ;;  %v1903_v44 = vld [vmem:[%s2572_s16 + $0x8] sm:$0xff]  }
 0xa7a   :  { %v1219_v20 = vpack.c.bf16 %v1217_v54, %v1217_v54  ;;  %v1904_v54 = vld [vmem:[%s2572_s16] sm:$0xff]  }
 0xa7b   :  { %v1940_v4 = vpop.eup %1939 }
 0xa7c   :  { %1834 = vmatmul.mubr.msk.bf16.vlgmr.msra.gmra.mxu1 %vm417_vm2, %v1219_v20  ;;  %v1218_v61 = vmul.f32 %v1940_v4, %v1936_v10  ;;  %v1661_v20 = vld [vmem:[%s2571_s15] ss:$0 sm:$0xff]  ;;  %s2143_s15 = smov [#allocation17]  }
 0xa7d   :  { %1847 = vmatprep.mubr.msk.bf16.mxu1 %vm2136_vm1, %v2135_v16  ;;  %1844 = vmatpush3.bf16.msra.mxu1 %v1897_v22  ;;  %s1608_s16 = sshll.u32 %s2143_s15, 4  ;;  %s1609_s16 = int_to_ptr.vmem [resolvable:$true] %s1608_s16 }
 0xa7e   :  { %v1220_v21 = vpack.c.bf16 %v1218_v61, %v1218_v61  ;;  %1845 = vmatprep.subr.bf16.mxu1 %v2135_v16  ;;  %s2093_s7 = scalar_lea.vmem %s1609_s16, 256  ;;  %p2098_p8 = scmp.lt.s32.totalorder %s1609_s16, %s1609_s16 }
 0xa7f   :  { %p2094_p7 = scmp.ne.s32.totalorder %s1609_s16, %s2093_s7  ;;  %p2099_p9 = scmp.lt.s32.totalorder %s2093_s7, %s2093_s7 }
 0xa80   :  { %1840 = vmatmul.mubr.msk.bf16.vlgmr.msra.gmra.mxu0 %vm417_vm2, %v1220_v21 }
 0xa81   :  { %1855 = vmatprep.mubr.msk.bf16.mxu0 %vm2136_vm1, %v2135_v16  ;;  %1846 = vmatpush3.bf16.msra.mxu1 %v1898_v23  ;;  %p2100_p10 = por %p2099_p9, %p2098_p8 }
 0xa82   :  { %1859 = vmatprep.subr.bf16.mxu1 %v2135_v16  ;;  %1852 = vmatpush3.bf16.msra.mxu0 %v1899_v60 }
 0xa83   :  { %1853 = vmatprep.subr.bf16.mxu0 %v2135_v16  ;;  %p2101_p11 = pnand %p2100_p10, %p2094_p7 }
 0xa86   :  { %1854 = vmatpush3.bf16.msra.mxu0 %v1900_v11 }
 0xb3c   :  { %v1263_v24 = vpop.f32.mrf.mxu1 }
 0xb3d   :  { %1319 = vrot.lane.b32.xlu0 %v1263_v24, %s2142_s23 }
 0xb3e   :  { %v1835_v25 = vpop.f32.mrf.mxu1 }
 0xb40   :  { %v1266_v26 = vpop.f32.mrf.mxu1  ;;  %v1311_v27 = vpop.f32.mrf.mxu0 }
 0xb41   :  { %1321 = vrot.lane.b32.xlu1 %v1311_v27, %s2142_s23 }
 0xb42   :  { %v1836_v28 = vpop.f32.mrf.mxu1  ;;  %v1841_v29 = vpop.f32.mrf.mxu0 }
 0xb44   :  { %v1314_v30 = vpop.f32.mrf.mxu0 }
 0xb46   :  { %v1842_v59 = vpop.f32.mrf.mxu0 }
 0xbaf   :  { %v1320_v31 = vpop.permute.xlu0 %1319 }
 0xbb0   :  { %1326 = vst.msk [vmem:[#allocation2] sm:$0xff] %vm1325_vm8, %v1320_v31 }
 0xbb3   :  { %v1322_v32 = vpop.permute.xlu1 %1321 }
 0xbb4   :  { %1327 = vst.msk [vmem:[#allocation2 + $0x8] sm:$0xff] %vm1325_vm8, %v1322_v32 }
 0xbb7   :  { %v1328_v33 = vld [vmem:[#allocation2] sm:$0xff] }
 0xbbb   :  { %v1329_v34 = vld [vmem:[#allocation2 + $0x8] sm:$0xff] }
 0xbbc   :  { %v1330_v35 = vpack.c.bf16 %v1329_v34, %v1328_v33 }
 0xbbe   :  { %1848 = vmatmul.mubr.msk.bf16.vlgmr.msra.gmra.mxu1 %vm161_vm0, %v1330_v35 }
 0xbbf   :  { %1867 = vmatprep.mubr.msk.bf16.mxu1 %vm2136_vm1, %v2135_v16  ;;  %1860 = vmatpush3.bf16.msra.mxu1 %v1901_v15 }
 0xbc0   :  { %1861 = vmatprep.subr.bf16.mxu1 %v2135_v16 }
 0xbc3   :  { %1862 = vmatpush3.bf16.msra.mxu1 %v1902_v19 }
 0xbc4   :  { %1863 = vmatprep.subr.bf16.mxu1 %v2135_v16 }
 0xbc7   :  { %1864 = vmatpush3.bf16.msra.mxu1 %v1903_v44 }
 0xbc8   :  { %1865 = vmatprep.subr.bf16.mxu1 %v2135_v16  ;;  %v1665_v16 = vld [vmem:[%s2573_s17] ss:$0 sm:$0xff] }
 0xbcb   :  { %1866 = vmatpush3.bf16.msra.mxu1 %v1904_v54 }
 0xc7e   :  { %v1391_v37 = vpop.f32.mrf.mxu1 }
 0xc7f   :  { %v1392_v38 = vadd.f32 %v1655_v36, %v1391_v37 }
 0xc80   :  { %v1849_v39 = vpop.f32.mrf.mxu1 }
 0xc81   :  { %v2506_v40 = vadd.f32 %v1392_v38, %v2267_v0 }
 0xc82   :  { %v1394_v41 = vpop.f32.mrf.mxu1 }
 0xc83   :  { %v1395_v42 = vadd.f32 %v1655_v36, %v1394_v41  ;;  %v1402_v43 = vsel %vm161_vm0, %v2506_v40, 0.0 }
 0xc84   :  { %1403 = vadd.xlane.f32.xlu0 %v1402_v43  ;;  %v1850_v45 = vpop.f32.mrf.mxu1 }
 0xc85   :  { %v2511_v47 = vadd.f32 %v1395_v42, %v2272_v1 }
 0xc87   :  { %v1405_v48 = vsel %vm161_vm0, %v2511_v47, 0.0 }
 0xc88   :  { %1406 = vadd.xlane.f32.xlu1 %v1405_v48 }
 0xd0d   :  { %v1404_v50 = vpop.xlane.xlu0 %1403 }
 0xd0e   :  { %v1408_v51 = vmul.f32 0.03125, %v1404_v50 }
 0xd10   :  { %v1410_v52 = vsub.f32 %v2506_v40, %v1408_v51 }
 0xd11   :  { %v1407_v0 = vpop.xlane.xlu1 %1406 }
 0xd12   :  { %v1409_v53 = vmul.f32 0.03125, %v1407_v0  ;;  %v1412_v55 = vmul.f32 %v1410_v52, %v1410_v52 }
 0xd14   :  { %v1411_v56 = vsub.f32 %v2511_v47, %v1409_v53  ;;  %v1414_v57 = vsel %vm161_vm0, %v1412_v55, 0.0 }
 0xd15   :  { %1415 = vadd.xlane.f32.xlu0 %v1414_v57 }
 0xd16   :  { %v1413_v58 = vmul.f32 %v1411_v56, %v1411_v56 }
 0xd18   :  { %v1417_v1 = vsel %vm161_vm0, %v1413_v58, 0.0 }
 0xd19   :  { %1418 = vadd.xlane.f32.xlu0 %v1417_v1 }
 0xd9e   :  { %v1416_v62 = vpop.xlane.xlu0 %1415 }
 0xd9f   :  { %v1420_v63 = vmul.f32 0.03125, %v1416_v62 }
 0xda1   :  { %v1422_v2 = vadd.f32 1e-06, %v1420_v63 }
 0xda2   :  { %v1419_v3 = vpop.xlane.xlu0 %1418 }
 0xda3   :  { %1941 = vrsqrt.f32 %v1422_v2  ;;  %v1421_v6 = vmul.f32 0.03125, %v1419_v3 }
 0xda5   :  { %v1423_v5 = vadd.f32 1e-06, %v1421_v6 }
 0xda7   :  { %1943 = vrsqrt.f32 %v1423_v5 }
 0xdb0   :  { %v1942_v46 = vpop.eup %1941 }
 0xdb1   :  { %v1426_v49 = vmul.f32 %v1942_v46, %v1410_v52 }
 0xdb3   :  { %v1434_v10 = vmul.f32 %v1659_v7, %v1426_v49 }
 0xdb4   :  { %v1944_v8 = vpop.eup %1943 }
 0xdb5   :  { %v1427_v9 = vmul.f32 %v1944_v8, %v1411_v56  ;;  %v1442_v14 = vadd.f32 %v1660_v12, %v1434_v10 }
 0xdb7   :  { %v1435_v13 = vmul.f32 %v1659_v7, %v1427_v9 }
 0xdb9   :  { %v1443_v17 = vadd.f32 %v1660_v12, %v1435_v13 }
 0xdbb   :  { %v1444_v18 = vpack.c.bf16 %v1443_v17, %v1442_v14 }
 0xdbd   :  { %1856 = vmatmul.mubr.msk.bf16.vlgmr.msra.gmra.mxu0 %vm161_vm0, %v1444_v18 }
 0xe7d   :  { %v1505_v4 = vpop.f32.mrf.mxu0 }
 0xe7e   :  { %v1506_v21 = vadd.f32 %v1661_v20, %v1505_v4 }
 0xe7f   :  { %v1857_v61 = vpop.f32.mrf.mxu0 }
 0xe80   :  { %v1512_v25 = vmax.f32 %v1506_v21, 0.0 }
 0xe81   :  { %v1508_v22 = vpop.f32.mrf.mxu0 }
 0xe82   :  { %v1509_v23 = vadd.f32 %v1661_v20, %v1508_v22 }
 0xe83   :  { %v1858_v24 = vpop.f32.mrf.mxu0 }
 0xe84   :  { %v1513_v26 = vmax.f32 %v1509_v23, 0.0 }
 0xe86   :  { %v1514_v27 = vpack.c.bf16 %v1513_v26, %v1512_v25 }
 0xe88   :  { %1868 = vmatmul.mubr.msk.bf16.vlgmr.msra.gmra.mxu1 %vm1554_vm9, %v1514_v27 }
 0xf48   :  { %v1592_v28 = vpop.f32.mrf.mxu1 }
 0xf49   :  { %v1593_v29 = vadd.f32 %v1665_v16, %v1592_v28 }
 0xf4a   :  { %v1869_v30 = vpop.f32.mrf.mxu1 }
 0xf4b   :  { %v1599_v59 = vadd.f32 %v1593_v29, %v2506_v40 }
 0xf4c   :  { %v1595_v31 = vpop.f32.mrf.mxu1 }
 0xf4d   :  { %1601 = vst.msk [vmem:[#allocation17] sm:$0xff] %vm161_vm0, %v1599_v59  ;;  %v1596_v32 = vadd.f32 %v1665_v16, %v1595_v31 }
 0xf4e   :  { %v1870_v33 = vpop.f32.mrf.mxu1 }
 0xf4f   :  { %v1600_v34 = vadd.f32 %v1596_v32, %v2511_v47 }
 0xf51   :  { %1602 = vst.msk [vmem:[#allocation17 + $0x8] sm:$0xff] %vm161_vm0, %v1600_v34 }
 0xf52   :  { %2104 = shalt.err (!%p2101_p11)
}
 0xf53   :  { %s2144_s17 = smov 128  }
 0xf54   :  { %1614 = dma.vmem_to_hbm [thread:$0]  %s1609_s16, 256, %s2574_s18, [#allocation5], %s2144_s17, %s2144_s17, %s2140_s20  }
 0xf55   :  { %2123 = dma.done.wait [#allocation5], 256  }
 0xf56   :  { %2124 = vsyncadd [#allocation5], 4294967040 }
 0xf57   :  { %1618 = vsyncpa [#allocation4], 1 }
 0xf58   :  { %1619 = vsyncpa [#allocation9], 1 }
 0xf59   :  { %1620 = vsyncpa [#allocation12], 1 }
 0xf5a   :  { %1621 = vsyncpa [#allocation15], 1 }
 0xf5b   :  { %1622 = vsyncpa [#allocation5], 1 }
 0xf5c   :  { %1623 = vsyncpa [#allocation6], 1 }

</bundles_post_ra>
